<compile_context>
chip_gen: v6e
topology: v6e:2x2x1
jax: 0.10.0
libtpu: 0.0.40
codegen_flags: <defaults>
</compile_context>

<pallas_src>
import jax
import jax.numpy as jnp
import numpy as np
from jax.experimental import pallas as pl
from jax.experimental.pallas import tpu as pltpu

EPS = 1e-5


# ------------------------------ kernels ------------------------------------ #
def _gn_epilogue(y, gavg, gamma, beta):
    # y: (Cout, P) f32.  gavg: (Cout, Cout) group-averaging matrix (1/cnt folded
    # in).  gamma/beta: (Cout, 1).  Returns normalized y (not yet ReLU'd).
    ch_sum = jnp.sum(y, axis=1, keepdims=True)            # (Cout, 1)  XLU
    ch_sq = jnp.sum(y * y, axis=1, keepdims=True)         # (Cout, 1)
    # Tiny full-precision stat matmuls (replaces 4 mask matmuls + 2 divides).
    # TODO(synk): merge into a single (Cout,2)-RHS matmul once minor-dim concat
    # of width-1 operands is guaranteed by the lowering.
    mean_c = jnp.dot(gavg, ch_sum, preferred_element_type=jnp.float32,
                     precision=jax.lax.Precision.HIGHEST)
    ex2_c = jnp.dot(gavg, ch_sq, preferred_element_type=jnp.float32,
                    precision=jax.lax.Precision.HIGHEST)
    var_c = ex2_c - mean_c * mean_c
    scale_c = gamma * jax.lax.rsqrt(var_c + EPS)
    shift_c = beta - mean_c * scale_c
    return y * scale_c + shift_c                          # one FMA per vreg


def conv_gn_relu_kernel(p_ref, w_ref, b_ref, g_ref, be_ref, gavg_ref, o_ref):
    # (Cout,K)@(K,P): bf16 operands -> single MXU pass, f32 accumulation.
    y = jnp.dot(w_ref[...], p_ref[...],
                preferred_element_type=jnp.float32) + b_ref[...]
    yn = _gn_epilogue(y, gavg_ref[...], g_ref[...], be_ref[...])
    o_ref[...] = jnp.maximum(yn, 0.0).astype(o_ref.dtype)


def conv_gn_skip_relu_kernel(p_ref, w_ref, b_ref, g_ref, be_ref, gavg_ref,
                             xs_ref, ws_ref, bs_ref, o_ref):
    y = jnp.dot(w_ref[...], p_ref[...],
                preferred_element_type=jnp.float32) + b_ref[...]
    # Skip projection issued before the GN reductions so the MXU work overlaps
    # the XLU/VPU epilogue (skip is added AFTER GroupNorm, matching the module).
    skip = jnp.dot(ws_ref[...], xs_ref[...],
                   preferred_element_type=jnp.float32) + bs_ref[...]
    yn = _gn_epilogue(y, gavg_ref[...], g_ref[...], be_ref[...])
    o_ref[...] = jnp.maximum(yn + skip, 0.0).astype(o_ref.dtype)


# --------------------------- pallas wrappers ------------------------------- #
def _vmem_limit_bytes(K, P, Cout, Cin=0):
    # 2x (double-buffered) patches/outputs + weights + small operands + slack.
    need = 2 * (2 * K * P * 2 + 2 * Cout * P * 4 + Cout * (K + Cin) * 2
                + 2 * Cin * P * 2 + Cout * Cout * 4 + 8 * Cout * 4)
    return int(min(max(need, 32 * 1024 * 1024), 96 * 1024 * 1024))


def fused_conv_gn_relu(p, w, b, gamma, beta, gavg, out_dtype=jnp.float32):
    N, K, P = p.shape
    Cout = w.shape[0]
    return pl.pallas_call(
        conv_gn_relu_kernel,
        out_shape=jax.ShapeDtypeStruct((N, Cout, P), out_dtype),
        grid=(N,),
        in_specs=[
            pl.BlockSpec((None, K, P), lambda n: (n, 0, 0)),
            pl.BlockSpec((Cout, K), lambda n: (0, 0)),
            pl.BlockSpec((Cout, 1), lambda n: (0, 0)),
            pl.BlockSpec((Cout, 1), lambda n: (0, 0)),
            pl.BlockSpec((Cout, 1), lambda n: (0, 0)),
            pl.BlockSpec((Cout, Cout), lambda n: (0, 0)),
        ],
        out_specs=pl.BlockSpec((None, Cout, P), lambda n: (n, 0, 0)),
        compiler_params=pltpu.CompilerParams(
            dimension_semantics=("parallel",),
            vmem_limit_bytes=_vmem_limit_bytes(K, P, Cout)),
    )(p.astype(jnp.bfloat16), w.astype(jnp.bfloat16),
      b.astype(jnp.float32), gamma.astype(jnp.float32),
      beta.astype(jnp.float32), gavg.astype(jnp.float32))


def fused_conv_gn_skip_relu(p, w, b, gamma, beta, gavg, xs, ws, bs,
                            out_dtype=jnp.float32):
    N, K, P = p.shape
    Cout = w.shape[0]
    Cin = xs.shape[1]
    return pl.pallas_call(
        conv_gn_skip_relu_kernel,
        out_shape=jax.ShapeDtypeStruct((N, Cout, P), out_dtype),
        grid=(N,),
        in_specs=[
            pl.BlockSpec((None, K, P), lambda n: (n, 0, 0)),
            pl.BlockSpec((Cout, K), lambda n: (0, 0)),
            pl.BlockSpec((Cout, 1), lambda n: (0, 0)),
            pl.BlockSpec((Cout, 1), lambda n: (0, 0)),
            pl.BlockSpec((Cout, 1), lambda n: (0, 0)),
            pl.BlockSpec((Cout, Cout), lambda n: (0, 0)),
            pl.BlockSpec((None, Cin, P), lambda n: (n, 0, 0)),
            pl.BlockSpec((Cout, Cin), lambda n: (0, 0)),
            pl.BlockSpec((Cout, 1), lambda n: (0, 0)),
        ],
        out_specs=pl.BlockSpec((None, Cout, P), lambda n: (n, 0, 0)),
        compiler_params=pltpu.CompilerParams(
            dimension_semantics=("parallel",),
            vmem_limit_bytes=_vmem_limit_bytes(K, P, Cout, Cin)),
    )(p.astype(jnp.bfloat16), w.astype(jnp.bfloat16),
      b.astype(jnp.float32), gamma.astype(jnp.float32),
      beta.astype(jnp.float32), gavg.astype(jnp.float32),
      xs.astype(jnp.bfloat16), ws.astype(jnp.bfloat16),
      bs.astype(jnp.float32))


# ------------------------------ JAX glue ----------------------------------- #
def im2col(x, k, stride, pad):
    # x: (N, C, H, W) -> patches (N, K=C*k*k, P=Ho*Wo); K ordering = (c, kh, kw)
    N, C, H, W = x.shape
    xp = jnp.pad(x, ((0, 0), (0, 0), (pad, pad), (pad, pad)))
    Ho = (H + 2 * pad - k) // stride + 1
    Wo = (W + 2 * pad - k) // stride + 1
    cols = []
    for i in range(k):
        for j in range(k):
            cols.append(xp[:, :, i:i + stride * Ho:stride,
                           j:j + stride * Wo:stride])
    p = jnp.stack(cols, axis=2)                       # (N, C, k*k, Ho, Wo)
    return p.reshape(N, C * k * k, Ho * Wo), Ho, Wo   # (N, K, P)


def _flat_w(w):
    # PyTorch OIHW (Cout, Ci, kh, kw) -> (Cout, K=Ci*kh*kw); matches im2col order
    return w.reshape(w.shape[0], -1)


def _col(v):
    return v.reshape(-1, 1)


def _group_avg(Cout, G, P):
    cpg = Cout // G
    same = ((jnp.arange(Cout)[:, None] // cpg) ==
            (jnp.arange(Cout)[None, :] // cpg)).astype(jnp.float32)
    return same / float(P * cpg)   # (mask_cg @ mask_gc) / count, folded


def analysis_transform(x, params, G=8):
    # TODO(synk): for large images / v7x (64 MiB VMEM) the per-sample (K, P)
    # block should be tiled along P with a two-pass GroupNorm reduction; at the
    # shapes used here a whole sample fits comfortably in VMEM.
    N, Cin, H, W = x.shape
    Cout = params["w1"].shape[0]

    # stage 1: conv1 (k5 s2 p2) + GN + ReLU   (intermediate kept in bf16)
    p1, H1, W1 = im2col(x, 5, 2, 2)
    y1 = fused_conv_gn_relu(p1, _flat_w(params["w1"]), _col(params["b1"]),
                            _col(params["g1"]), _col(params["be1"]),
                            _group_avg(Cout, G, H1 * W1), jnp.bfloat16)
    x1 = y1.reshape(N, Cout, H1, W1)                  # channels-major: no transpose

    # stage 2: conv2 (k5 s2 p2) + GN + ReLU
    p2, H2, W2 = im2col(x1, 5, 2, 2)
    y2 = fused_conv_gn_relu(p2, _flat_w(params["w2"]), _col(params["b2"]),
                            _col(params["g2"]), _col(params["be2"]),
                            _group_avg(Cout, G, H2 * W2), jnp.bfloat16)
    x2 = y2.reshape(N, Cout, H2, W2)

    # stage 3: conv3 (k3 s1 p1) + GN, skip conv (k1 s4 p0), add, ReLU
    p3, H3, W3 = im2col(x2, 3, 1, 1)
    xs = x[:, :, ::4, ::4]                            # k1/s4/p0 sampling
    assert xs.shape[2] == H3 and xs.shape[3] == W3, "skip/main spatial mismatch"
    xs = xs.reshape(N, Cin, H3 * W3)
    y3 = fused_conv_gn_skip_relu(p3, _flat_w(params["w3"]), _col(params["b3"]),
                                 _col(params["g3"]), _col(params["be3"]),
                                 _group_avg(Cout, G, H3 * W3),
                                 xs, _flat_w(params["ws"]), _col(params["bs"]),
                                 jnp.float32)
    return y3.reshape(N, Cout, H3, W3)


# ----------------------------- references ---------------------------------- #
def matched_forward(x, params, G=8):
    # Pure-JAX mirror of the Pallas math (bf16 operands, f32 accumulation,
    # identical GroupNorm formulation).  Used as a tight numerical check.
    N, Cin, H, W = x.shape
    Cout = params["w1"].shape[0]

    def fused(pt, w, b, g, be):
        P = pt.shape[2]
        gavg = _group_avg(Cout, G, P)
        y = jnp.einsum("ok,nkp->nop", _flat_w(w).astype(jnp.bfloat16),
                       pt.astype(jnp.bfloat16),
                       preferred_element_type=jnp.float32) + _col(b)[None]
        return jax.vmap(lambda yy: _gn_epilogue(yy, gavg, _col(g), _col(be)))(y)

    p1, H1, W1 = im2col(x, 5, 2, 2)
    x1 = jax.nn.relu(fused(p1, params["w1"], params["b1"], params["g1"],
                           params["be1"])).astype(jnp.bfloat16)
    x1 = x1.reshape(N, Cout, H1, W1)
    p2, H2, W2 = im2col(x1, 5, 2, 2)
    x2 = jax.nn.relu(fused(p2, params["w2"], params["b2"], params["g2"],
                           params["be2"])).astype(jnp.bfloat16)
    x2 = x2.reshape(N, Cout, H2, W2)
    p3, H3, W3 = im2col(x2, 3, 1, 1)
    y3 = fused(p3, params["w3"], params["b3"], params["g3"], params["be3"])
    xs = x[:, :, ::4, ::4].reshape(N, Cin, H3 * W3)
    skip = jnp.einsum("oc,ncp->nop",
                      _flat_w(params["ws"]).astype(jnp.bfloat16),
                      xs.astype(jnp.bfloat16),
                      preferred_element_type=jnp.float32) + _col(params["bs"])[None]
    return jax.nn.relu(y3 + skip).reshape(N, Cout, H3, W3)


def ref_forward(x, params, G=8):
    # Exact f32 reference matching the PyTorch module semantics.
    def conv2d(x, w, b, stride, pad):
        y = jax.lax.conv_general_dilated(
            x, w, (stride, stride), ((pad, pad), (pad, pad)),
            dimension_numbers=("NCHW", "OIHW", "NCHW"),
            precision=jax.lax.Precision.HIGHEST)
        return y + b.reshape(1, -1, 1, 1)

    def gn(x, g, be):
        N, C, H, W = x.shape
        xr = x.reshape(N, G, C // G, H, W)
        m = xr.mean(axis=(2, 3, 4), keepdims=True)
        v = xr.var(axis=(2, 3, 4), keepdims=True)
        xn = ((xr - m) / jnp.sqrt(v + EPS)).reshape(N, C, H, W)
        return xn * g.reshape(1, -1, 1, 1) + be.reshape(1, -1, 1, 1)

    o = jax.nn.relu(gn(conv2d(x, params["w1"], params["b1"], 2, 2),
                       params["g1"], params["be1"]))
    o = jax.nn.relu(gn(conv2d(o, params["w2"], params["b2"], 2, 2),
                       params["g2"], params["be2"]))
    o = gn(conv2d(o, params["w3"], params["b3"], 1, 1),
           params["g3"], params["be3"])
    skip = conv2d(x, params["ws"], params["bs"], 4, 0)
    return jax.nn.relu(o + skip)


# ------------------------------- params ------------------------------------ #
def init_params(key, cin, cout):
    ks = jax.random.split(key, 14)
    r = lambda k, s, scale=0.1: scale * jax.random.normal(k, s, jnp.float32)
    return dict(
        w1=r(ks[0], (cout, cin, 5, 5)), b1=r(ks[1], (cout,)),
        w2=r(ks[2], (cout, cout, 5, 5)), b2=r(ks[3], (cout,)),
        w3=r(ks[4], (cout, cout, 3, 3)), b3=r(ks[5], (cout,)),
        ws=r(ks[6], (cout, cin, 1, 1)), bs=r(ks[7], (cout,)),
        g1=1.0 + r(ks[8], (cout,)), be1=r(ks[9], (cout,)),
        g2=1.0 + r(ks[10], (cout,)), be2=r(ks[11], (cout,)),
        g3=1.0 + r(ks[12], (cout,)), be3=r(ks[13], (cout,)),
    )


if __name__ == "__main__":
    # Small shapes: batch=2, input_channels=8, latent_channels=16 (8 GN groups),
    # spatial 16x16 -> latent 4x4.
    N, Cin, H, W = 2, 8, 16, 16
    Cout, G = 16, 8

    key = jax.random.PRNGKey(0)
    kx, kp = jax.random.split(key)
    x = jax.random.normal(kx, (N, Cin, H, W), jnp.float32)
    params = init_params(kp, Cin, Cout)

    out = jax.block_until_ready(
        jax.jit(lambda xx: analysis_transform(xx, params, G))(x))
    assert out.shape == (N, Cout, H // 4, W // 4)

    # Tight check vs. a pure-JAX mirror of the same bf16/f32 math.
    matched = jax.block_until_ready(
        jax.jit(lambda xx: matched_forward(xx, params, G))(x))
    np.testing.assert_allclose(np.asarray(out), np.asarray(matched),
                               rtol=1e-2, atol=1e-2)

    # Loose semantic check vs. the exact f32 reference (bf16 compute tolerance).
    ref = jax.block_until_ready(
        jax.jit(lambda xx: ref_forward(xx, params, G))(x))
    rel = (np.linalg.norm(np.asarray(out) - np.asarray(ref)) /
           (np.linalg.norm(np.asarray(ref)) + 1e-12))
    assert rel < 2e-2, f"relative error vs f32 reference too large: {rel}"

    print("KERNEL_OK")
</pallas_src>

<mosaic_0001>
module attributes {stable_mosaic.version = 11 : i64} {
  func.func @conv_gn_relu_kernel(%arg0: i32, %arg1: memref<1x200x64xbf16, #tpu.memory_space<vmem>>, %arg2: memref<16x200xbf16, #tpu.memory_space<vmem>>, %arg3: memref<16x1xf32, #tpu.memory_space<vmem>>, %arg4: memref<16x1xf32, #tpu.memory_space<vmem>>, %arg5: memref<16x1xf32, #tpu.memory_space<vmem>>, %arg6: memref<16x16xf32, #tpu.memory_space<vmem>>, %arg7: memref<1x16x64xbf16, #tpu.memory_space<vmem>>) attributes {dimension_semantics = [#tpu.dimension_semantics<parallel>], iteration_bounds = array<i64: 2>, scalar_prefetch = 0 : i64, scratch_operands = 0 : i64, tpu.core_type = #tpu.core_type<tc>, window_params = [{transform_indices = @transform_0, window_bounds = array<i64: 1, 200, 64>}, {pipeline_mode = #tpu.pipeline_mode<synchronous>, transform_indices = @transform_1, window_bounds = array<i64: 16, 200>}, {pipeline_mode = #tpu.pipeline_mode<synchronous>, transform_indices = @transform_2, window_bounds = array<i64: 16, 1>}, {pipeline_mode = #tpu.pipeline_mode<synchronous>, transform_indices = @transform_3, window_bounds = array<i64: 16, 1>}, {pipeline_mode = #tpu.pipeline_mode<synchronous>, transform_indices = @transform_4, window_bounds = array<i64: 16, 1>}, {pipeline_mode = #tpu.pipeline_mode<synchronous>, transform_indices = @transform_5, window_bounds = array<i64: 16, 16>}, {transform_indices = @transform_6, window_bounds = array<i64: 1, 16, 64>}]} {
    %c0 = arith.constant 0 : index
    %c0_0 = arith.constant 0 : index
    %0 = vector.load %arg2[%c0, %c0_0] : memref<16x200xbf16, #tpu.memory_space<vmem>>, vector<16x200xbf16>
    %c0_1 = arith.constant 0 : index
    %c0_2 = arith.constant 0 : index
    %c0_3 = arith.constant 0 : index
    %1 = vector.load %arg1[%c0_1, %c0_2, %c0_3] : memref<1x200x64xbf16, #tpu.memory_space<vmem>>, vector<1x200x64xbf16>
    %2 = vector.shape_cast %1 : vector<1x200x64xbf16> to vector<200x64xbf16>
    %cst = arith.constant dense<0.000000e+00> : vector<16x64xf32>
    %3 = tpu.matmul %0, %2, %cst {dimension_numbers = #tpu.dot_dimension_numbers<[1], [0], [0], [1], [0, 0, 1, 1], [], []>} : vector<16x200xbf16>, vector<200x64xbf16>, vector<16x64xf32> -> vector<16x64xf32>
    %c0_4 = arith.constant 0 : index
    %c0_5 = arith.constant 0 : index
    %4 = vector.load %arg3[%c0_4, %c0_5] : memref<16x1xf32, #tpu.memory_space<vmem>>, vector<16x1xf32>
    %5 = vector.broadcast %4 : vector<16x1xf32> to vector<16x64xf32>
    %6 = arith.addf %3, %5 : vector<16x64xf32>
    %c0_6 = arith.constant 0 : index
    %c0_7 = arith.constant 0 : index
    %7 = vector.load %arg6[%c0_6, %c0_7] : memref<16x16xf32, #tpu.memory_space<vmem>>, vector<16x16xf32>
    %c0_8 = arith.constant 0 : index
    %c0_9 = arith.constant 0 : index
    %8 = vector.load %arg4[%c0_8, %c0_9] : memref<16x1xf32, #tpu.memory_space<vmem>>, vector<16x1xf32>
    %c0_10 = arith.constant 0 : index
    %c0_11 = arith.constant 0 : index
    %9 = vector.load %arg5[%c0_10, %c0_11] : memref<16x1xf32, #tpu.memory_space<vmem>>, vector<16x1xf32>
    %cst_12 = arith.constant dense<0.000000e+00> : vector<16xf32>
    %10 = vector.multi_reduction <add>, %6, %cst_12 [1] : vector<16x64xf32> to vector<16xf32>
    %11 = vector.shape_cast %10 : vector<16xf32> to vector<16x1xf32>
    %12 = arith.mulf %6, %6 : vector<16x64xf32>
    %cst_13 = arith.constant dense<0.000000e+00> : vector<16xf32>
    %13 = vector.multi_reduction <add>, %12, %cst_13 [1] : vector<16x64xf32> to vector<16xf32>
    %14 = vector.shape_cast %13 : vector<16xf32> to vector<16x1xf32>
    %cst_14 = arith.constant dense<0.000000e+00> : vector<16x1xf32>
    %15 = tpu.matmul %7, %11, %cst_14 {dimension_numbers = #tpu.dot_dimension_numbers<[1], [0], [0], [1], [0, 0, 1, 1], [], []>, precision = #tpu.contract_precision<fp32>} : vector<16x16xf32>, vector<16x1xf32>, vector<16x1xf32> -> vector<16x1xf32>
    %cst_15 = arith.constant dense<0.000000e+00> : vector<16x1xf32>
    %16 = tpu.matmul %7, %14, %cst_15 {dimension_numbers = #tpu.dot_dimension_numbers<[1], [0], [0], [1], [0, 0, 1, 1], [], []>, precision = #tpu.contract_precision<fp32>} : vector<16x16xf32>, vector<16x1xf32>, vector<16x1xf32> -> vector<16x1xf32>
    %17 = arith.mulf %15, %15 : vector<16x1xf32>
    %18 = arith.subf %16, %17 : vector<16x1xf32>
    %cst_16 = arith.constant 9.99999974E-6 : f32
    %19 = vector.broadcast %cst_16 : f32 to vector<16x1xf32>
    %20 = arith.addf %18, %19 : vector<16x1xf32>
    %21 = math.rsqrt %20 : vector<16x1xf32>
    %22 = arith.mulf %8, %21 : vector<16x1xf32>
    %23 = arith.mulf %15, %22 : vector<16x1xf32>
    %24 = arith.subf %9, %23 : vector<16x1xf32>
    %25 = vector.broadcast %22 : vector<16x1xf32> to vector<16x64xf32>
    %26 = arith.mulf %6, %25 : vector<16x64xf32>
    %27 = vector.broadcast %24 : vector<16x1xf32> to vector<16x64xf32>
    %28 = arith.addf %26, %27 : vector<16x64xf32>
    %cst_17 = arith.constant 0.000000e+00 : f32
    %29 = vector.broadcast %cst_17 : f32 to vector<16x64xf32>
    %30 = arith.maximumf %28, %29 : vector<16x64xf32>
    %31 = arith.truncf %30 : vector<16x64xf32> to vector<16x64xbf16>
    %c0_18 = arith.constant 0 : index
    %c0_19 = arith.constant 0 : index
    %c0_20 = arith.constant 0 : index
    %32 = vector.load %arg7[%c0_18, %c0_19, %c0_20] : memref<1x16x64xbf16, #tpu.memory_space<vmem>>, vector<1x16x64xbf16>
    %33 = vector.shape_cast %32 : vector<1x16x64xbf16> to vector<16x64xbf16>
    %34 = vector.shape_cast %31 : vector<16x64xbf16> to vector<1x16x64xbf16>
    tpu.vector_store %arg7[%c0_18, %c0_19, %c0_20], %34 {strides = array<i32>} : memref<1x16x64xbf16, #tpu.memory_space<vmem>>, vector<1x16x64xbf16>,
    return
  }
  func.func @transform_0(%arg0: i32) -> (i32, i32, i32) {
    %c0_i32 = arith.constant 0 : i32
    %c0_i32_0 = arith.constant 0 : i32
    %c0_i32_1 = arith.constant 0 : i32
    return %arg0, %c0_i32, %c0_i32_0 : i32, i32, i32
  }
  func.func @transform_1(%arg0: i32) -> (i32, i32) {
    %c0_i32 = arith.constant 0 : i32
    %c0_i32_0 = arith.constant 0 : i32
    %c0_i32_1 = arith.constant 0 : i32
    return %c0_i32, %c0_i32_0 : i32, i32
  }
  func.func @transform_2(%arg0: i32) -> (i32, i32) {
    %c0_i32 = arith.constant 0 : i32
    %c0_i32_0 = arith.constant 0 : i32
    %c0_i32_1 = arith.constant 0 : i32
    return %c0_i32, %c0_i32_0 : i32, i32
  }
  func.func @transform_3(%arg0: i32) -> (i32, i32) {
    %c0_i32 = arith.constant 0 : i32
    %c0_i32_0 = arith.constant 0 : i32
    %c0_i32_1 = arith.constant 0 : i32
    return %c0_i32, %c0_i32_0 : i32, i32
  }
  func.func @transform_4(%arg0: i32) -> (i32, i32) {
    %c0_i32 = arith.constant 0 : i32
    %c0_i32_0 = arith.constant 0 : i32
    %c0_i32_1 = arith.constant 0 : i32
    return %c0_i32, %c0_i32_0 : i32, i32
  }
  func.func @transform_5(%arg0: i32) -> (i32, i32) {
    %c0_i32 = arith.constant 0 : i32
    %c0_i32_0 = arith.constant 0 : i32
    %c0_i32_1 = arith.constant 0 : i32
    return %c0_i32, %c0_i32_0 : i32, i32
  }
  func.func @transform_6(%arg0: i32) -> (i32, i32, i32) {
    %c0_i32 = arith.constant 0 : i32
    %c0_i32_0 = arith.constant 0 : i32
    %c0_i32_1 = arith.constant 0 : i32
    return %arg0, %c0_i32, %c0_i32_0 : i32, i32, i32
  }
}

module attributes {stable_mosaic.version = 11 : i64} {
  func.func @conv_gn_relu_kernel(%arg0: i32, %arg1: memref<1x400x16xbf16, #tpu.memory_space<vmem>>, %arg2: memref<16x400xbf16, #tpu.memory_space<vmem>>, %arg3: memref<16x1xf32, #tpu.memory_space<vmem>>, %arg4: memref<16x1xf32, #tpu.memory_space<vmem>>, %arg5: memref<16x1xf32, #tpu.memory_space<vmem>>, %arg6: memref<16x16xf32, #tpu.memory_space<vmem>>, %arg7: memref<1x16x16xbf16, #tpu.memory_space<vmem>>) attributes {dimension_semantics = [#tpu.dimension_semantics<parallel>], iteration_bounds = array<i64: 2>, scalar_prefetch = 0 : i64, scratch_operands = 0 : i64, tpu.core_type = #tpu.core_type<tc>, window_params = [{transform_indices = @transform_0, window_bounds = array<i64: 1, 400, 16>}, {pipeline_mode = #tpu.pipeline_mode<synchronous>, transform_indices = @transform_1, window_bounds = array<i64: 16, 400>}, {pipeline_mode = #tpu.pipeline_mode<synchronous>, transform_indices = @transform_2, window_bounds = array<i64: 16, 1>}, {pipeline_mode = #tpu.pipeline_mode<synchronous>, transform_indices = @transform_3, window_bounds = array<i64: 16, 1>}, {pipeline_mode = #tpu.pipeline_mode<synchronous>, transform_indices = @transform_4, window_bounds = array<i64: 16, 1>}, {pipeline_mode = #tpu.pipeline_mode<synchronous>, transform_indices = @transform_5, window_bounds = array<i64: 16, 16>}, {transform_indices = @transform_6, window_bounds = array<i64: 1, 16, 16>}]} {
    %c0 = arith.constant 0 : index
    %c0_0 = arith.constant 0 : index
    %0 = vector.load %arg2[%c0, %c0_0] : memref<16x400xbf16, #tpu.memory_space<vmem>>, vector<16x400xbf16>
    %c0_1 = arith.constant 0 : index
    %c0_2 = arith.constant 0 : index
    %c0_3 = arith.constant 0 : index
    %1 = vector.load %arg1[%c0_1, %c0_2, %c0_3] : memref<1x400x16xbf16, #tpu.memory_space<vmem>>, vector<1x400x16xbf16>
    %2 = vector.shape_cast %1 : vector<1x400x16xbf16> to vector<400x16xbf16>
    %cst = arith.constant dense<0.000000e+00> : vector<16x16xf32>
    %3 = tpu.matmul %0, %2, %cst {dimension_numbers = #tpu.dot_dimension_numbers<[1], [0], [0], [1], [0, 0, 1, 1], [], []>} : vector<16x400xbf16>, vector<400x16xbf16>, vector<16x16xf32> -> vector<16x16xf32>
    %c0_4 = arith.constant 0 : index
    %c0_5 = arith.constant 0 : index
    %4 = vector.load %arg3[%c0_4, %c0_5] : memref<16x1xf32, #tpu.memory_space<vmem>>, vector<16x1xf32>
    %5 = vector.broadcast %4 : vector<16x1xf32> to vector<16x16xf32>
    %6 = arith.addf %3, %5 : vector<16x16xf32>
    %c0_6 = arith.constant 0 : index
    %c0_7 = arith.constant 0 : index
    %7 = vector.load %arg6[%c0_6, %c0_7] : memref<16x16xf32, #tpu.memory_space<vmem>>, vector<16x16xf32>
    %c0_8 = arith.constant 0 : index
    %c0_9 = arith.constant 0 : index
    %8 = vector.load %arg4[%c0_8, %c0_9] : memref<16x1xf32, #tpu.memory_space<vmem>>, vector<16x1xf32>
    %c0_10 = arith.constant 0 : index
    %c0_11 = arith.constant 0 : index
    %9 = vector.load %arg5[%c0_10, %c0_11] : memref<16x1xf32, #tpu.memory_space<vmem>>, vector<16x1xf32>
    %cst_12 = arith.constant dense<0.000000e+00> : vector<16xf32>
    %10 = vector.multi_reduction <add>, %6, %cst_12 [1] : vector<16x16xf32> to vector<16xf32>
    %11 = vector.shape_cast %10 : vector<16xf32> to vector<16x1xf32>
    %12 = arith.mulf %6, %6 : vector<16x16xf32>
    %cst_13 = arith.constant dense<0.000000e+00> : vector<16xf32>
    %13 = vector.multi_reduction <add>, %12, %cst_13 [1] : vector<16x16xf32> to vector<16xf32>
    %14 = vector.shape_cast %13 : vector<16xf32> to vector<16x1xf32>
    %cst_14 = arith.constant dense<0.000000e+00> : vector<16x1xf32>
    %15 = tpu.matmul %7, %11, %cst_14 {dimension_numbers = #tpu.dot_dimension_numbers<[1], [0], [0], [1], [0, 0, 1, 1], [], []>, precision = #tpu.contract_precision<fp32>} : vector<16x16xf32>, vector<16x1xf32>, vector<16x1xf32> -> vector<16x1xf32>
    %cst_15 = arith.constant dense<0.000000e+00> : vector<16x1xf32>
    %16 = tpu.matmul %7, %14, %cst_15 {dimension_numbers = #tpu.dot_dimension_numbers<[1], [0], [0], [1], [0, 0, 1, 1], [], []>, precision = #tpu.contract_precision<fp32>} : vector<16x16xf32>, vector<16x1xf32>, vector<16x1xf32> -> vector<16x1xf32>
    %17 = arith.mulf %15, %15 : vector<16x1xf32>
    %18 = arith.subf %16, %17 : vector<16x1xf32>
    %cst_16 = arith.constant 9.99999974E-6 : f32
    %19 = vector.broadcast %cst_16 : f32 to vector<16x1xf32>
    %20 = arith.addf %18, %19 : vector<16x1xf32>
    %21 = math.rsqrt %20 : vector<16x1xf32>
    %22 = arith.mulf %8, %21 : vector<16x1xf32>
    %23 = arith.mulf %15, %22 : vector<16x1xf32>
    %24 = arith.subf %9, %23 : vector<16x1xf32>
    %25 = vector.broadcast %22 : vector<16x1xf32> to vector<16x16xf32>
    %26 = arith.mulf %6, %25 : vector<16x16xf32>
    %27 = vector.broadcast %24 : vector<16x1xf32> to vector<16x16xf32>
    %28 = arith.addf %26, %27 : vector<16x16xf32>
    %cst_17 = arith.constant 0.000000e+00 : f32
    %29 = vector.broadcast %cst_17 : f32 to vector<16x16xf32>
    %30 = arith.maximumf %28, %29 : vector<16x16xf32>
    %31 = arith.truncf %30 : vector<16x16xf32> to vector<16x16xbf16>
    %c0_18 = arith.constant 0 : index
    %c0_19 = arith.constant 0 : index
    %c0_20 = arith.constant 0 : index
    %32 = vector.load %arg7[%c0_18, %c0_19, %c0_20] : memref<1x16x16xbf16, #tpu.memory_space<vmem>>, vector<1x16x16xbf16>
    %33 = vector.shape_cast %32 : vector<1x16x16xbf16> to vector<16x16xbf16>
    %34 = vector.shape_cast %31 : vector<16x16xbf16> to vector<1x16x16xbf16>
    tpu.vector_store %arg7[%c0_18, %c0_19, %c0_20], %34 {strides = array<i32>} : memref<1x16x16xbf16, #tpu.memory_space<vmem>>, vector<1x16x16xbf16>,
    return
  }
  func.func @transform_0(%arg0: i32) -> (i32, i32, i32) {
    %c0_i32 = arith.constant 0 : i32
    %c0_i32_0 = arith.constant 0 : i32
    %c0_i32_1 = arith.constant 0 : i32
    return %arg0, %c0_i32, %c0_i32_0 : i32, i32, i32
  }
  func.func @transform_1(%arg0: i32) -> (i32, i32) {
    %c0_i32 = arith.constant 0 : i32
    %c0_i32_0 = arith.constant 0 : i32
    %c0_i32_1 = arith.constant 0 : i32
    return %c0_i32, %c0_i32_0 : i32, i32
  }
  func.func @transform_2(%arg0: i32) -> (i32, i32) {
    %c0_i32 = arith.constant 0 : i32
    %c0_i32_0 = arith.constant 0 : i32
    %c0_i32_1 = arith.constant 0 : i32
    return %c0_i32, %c0_i32_0 : i32, i32
  }
  func.func @transform_3(%arg0: i32) -> (i32, i32) {
    %c0_i32 = arith.constant 0 : i32
    %c0_i32_0 = arith.constant 0 : i32
    %c0_i32_1 = arith.constant 0 : i32
    return %c0_i32, %c0_i32_0 : i32, i32
  }
  func.func @transform_4(%arg0: i32) -> (i32, i32) {
    %c0_i32 = arith.constant 0 : i32
    %c0_i32_0 = arith.constant 0 : i32
    %c0_i32_1 = arith.constant 0 : i32
    return %c0_i32, %c0_i32_0 : i32, i32
  }
  func.func @transform_5(%arg0: i32) -> (i32, i32) {
    %c0_i32 = arith.constant 0 : i32
    %c0_i32_0 = arith.constant 0 : i32
    %c0_i32_1 = arith.constant 0 : i32
    return %c0_i32, %c0_i32_0 : i32, i32
  }
  func.func @transform_6(%arg0: i32) -> (i32, i32, i32) {
    %c0_i32 = arith.constant 0 : i32
    %c0_i32_0 = arith.constant 0 : i32
    %c0_i32_1 = arith.constant 0 : i32
    return %arg0, %c0_i32, %c0_i32_0 : i32, i32, i32
  }
}

module attributes {stable_mosaic.version = 11 : i64} {
  func.func @conv_gn_skip_relu_kernel(%arg0: i32, %arg1: memref<1x144x16xbf16, #tpu.memory_space<vmem>>, %arg2: memref<16x144xbf16, #tpu.memory_space<vmem>>, %arg3: memref<16x1xf32, #tpu.memory_space<vmem>>, %arg4: memref<16x1xf32, #tpu.memory_space<vmem>>, %arg5: memref<16x1xf32, #tpu.memory_space<vmem>>, %arg6: memref<16x16xf32, #tpu.memory_space<vmem>>, %arg7: memref<1x8x16xbf16, #tpu.memory_space<vmem>>, %arg8: memref<16x8xbf16, #tpu.memory_space<vmem>>, %arg9: memref<16x1xf32, #tpu.memory_space<vmem>>, %arg10: memref<1x16x16xf32, #tpu.memory_space<vmem>>) attributes {dimension_semantics = [#tpu.dimension_semantics<parallel>], iteration_bounds = array<i64: 2>, scalar_prefetch = 0 : i64, scratch_operands = 0 : i64, tpu.core_type = #tpu.core_type<tc>, window_params = [{transform_indices = @transform_0, window_bounds = array<i64: 1, 144, 16>}, {pipeline_mode = #tpu.pipeline_mode<synchronous>, transform_indices = @transform_1, window_bounds = array<i64: 16, 144>}, {pipeline_mode = #tpu.pipeline_mode<synchronous>, transform_indices = @transform_2, window_bounds = array<i64: 16, 1>}, {pipeline_mode = #tpu.pipeline_mode<synchronous>, transform_indices = @transform_3, window_bounds = array<i64: 16, 1>}, {pipeline_mode = #tpu.pipeline_mode<synchronous>, transform_indices = @transform_4, window_bounds = array<i64: 16, 1>}, {pipeline_mode = #tpu.pipeline_mode<synchronous>, transform_indices = @transform_5, window_bounds = array<i64: 16, 16>}, {transform_indices = @transform_6, window_bounds = array<i64: 1, 8, 16>}, {pipeline_mode = #tpu.pipeline_mode<synchronous>, transform_indices = @transform_7, window_bounds = array<i64: 16, 8>}, {pipeline_mode = #tpu.pipeline_mode<synchronous>, transform_indices = @transform_8, window_bounds = array<i64: 16, 1>}, {transform_indices = @transform_9, window_bounds = array<i64: 1, 16, 16>}]} {
    %c0 = arith.constant 0 : index
    %c0_0 = arith.constant 0 : index
    %0 = vector.load %arg2[%c0, %c0_0] : memref<16x144xbf16, #tpu.memory_space<vmem>>, vector<16x144xbf16>
    %c0_1 = arith.constant 0 : index
    %c0_2 = arith.constant 0 : index
    %c0_3 = arith.constant 0 : index
    %1 = vector.load %arg1[%c0_1, %c0_2, %c0_3] : memref<1x144x16xbf16, #tpu.memory_space<vmem>>, vector<1x144x16xbf16>
    %2 = vector.shape_cast %1 : vector<1x144x16xbf16> to vector<144x16xbf16>
    %cst = arith.constant dense<0.000000e+00> : vector<16x16xf32>
    %3 = tpu.matmul %0, %2, %cst {dimension_numbers = #tpu.dot_dimension_numbers<[1], [0], [0], [1], [0, 0, 1, 1], [], []>} : vector<16x144xbf16>, vector<144x16xbf16>, vector<16x16xf32> -> vector<16x16xf32>
    %c0_4 = arith.constant 0 : index
    %c0_5 = arith.constant 0 : index
    %4 = vector.load %arg3[%c0_4, %c0_5] : memref<16x1xf32, #tpu.memory_space<vmem>>, vector<16x1xf32>
    %5 = vector.broadcast %4 : vector<16x1xf32> to vector<16x16xf32>
    %6 = arith.addf %3, %5 : vector<16x16xf32>
    %c0_6 = arith.constant 0 : index
    %c0_7 = arith.constant 0 : index
    %7 = vector.load %arg8[%c0_6, %c0_7] : memref<16x8xbf16, #tpu.memory_space<vmem>>, vector<16x8xbf16>
    %c0_8 = arith.constant 0 : index
    %c0_9 = arith.constant 0 : index
    %c0_10 = arith.constant 0 : index
    %8 = vector.load %arg7[%c0_8, %c0_9, %c0_10] : memref<1x8x16xbf16, #tpu.memory_space<vmem>>, vector<1x8x16xbf16>
    %9 = vector.shape_cast %8 : vector<1x8x16xbf16> to vector<8x16xbf16>
    %cst_11 = arith.constant dense<0.000000e+00> : vector<16x16xf32>
    %10 = tpu.matmul %7, %9, %cst_11 {dimension_numbers = #tpu.dot_dimension_numbers<[1], [0], [0], [1], [0, 0, 1, 1], [], []>} : vector<16x8xbf16>, vector<8x16xbf16>, vector<16x16xf32> -> vector<16x16xf32>
    %c0_12 = arith.constant 0 : index
    %c0_13 = arith.constant 0 : index
    %11 = vector.load %arg9[%c0_12, %c0_13] : memref<16x1xf32, #tpu.memory_space<vmem>>, vector<16x1xf32>
    %12 = vector.broadcast %11 : vector<16x1xf32> to vector<16x16xf32>
    %13 = arith.addf %10, %12 : vector<16x16xf32>
    %c0_14 = arith.constant 0 : index
    %c0_15 = arith.constant 0 : index
    %14 = vector.load %arg6[%c0_14, %c0_15] : memref<16x16xf32, #tpu.memory_space<vmem>>, vector<16x16xf32>
    %c0_16 = arith.constant 0 : index
    %c0_17 = arith.constant 0 : index
    %15 = vector.load %arg4[%c0_16, %c0_17] : memref<16x1xf32, #tpu.memory_space<vmem>>, vector<16x1xf32>
    %c0_18 = arith.constant 0 : index
    %c0_19 = arith.constant 0 : index
    %16 = vector.load %arg5[%c0_18, %c0_19] : memref<16x1xf32, #tpu.memory_space<vmem>>, vector<16x1xf32>
    %cst_20 = arith.constant dense<0.000000e+00> : vector<16xf32>
    %17 = vector.multi_reduction <add>, %6, %cst_20 [1] : vector<16x16xf32> to vector<16xf32>
    %18 = vector.shape_cast %17 : vector<16xf32> to vector<16x1xf32>
    %19 = arith.mulf %6, %6 : vector<16x16xf32>
    %cst_21 = arith.constant dense<0.000000e+00> : vector<16xf32>
    %20 = vector.multi_reduction <add>, %19, %cst_21 [1] : vector<16x16xf32> to vector<16xf32>
    %21 = vector.shape_cast %20 : vector<16xf32> to vector<16x1xf32>
    %cst_22 = arith.constant dense<0.000000e+00> : vector<16x1xf32>
    %22 = tpu.matmul %14, %18, %cst_22 {dimension_numbers = #tpu.dot_dimension_numbers<[1], [0], [0], [1], [0, 0, 1, 1], [], []>, precision = #tpu.contract_precision<fp32>} : vector<16x16xf32>, vector<16x1xf32>, vector<16x1xf32> -> vector<16x1xf32>
    %cst_23 = arith.constant dense<0.000000e+00> : vector<16x1xf32>
    %23 = tpu.matmul %14, %21, %cst_23 {dimension_numbers = #tpu.dot_dimension_numbers<[1], [0], [0], [1], [0, 0, 1, 1], [], []>, precision = #tpu.contract_precision<fp32>} : vector<16x16xf32>, vector<16x1xf32>, vector<16x1xf32> -> vector<16x1xf32>
    %24 = arith.mulf %22, %22 : vector<16x1xf32>
    %25 = arith.subf %23, %24 : vector<16x1xf32>
    %cst_24 = arith.constant 9.99999974E-6 : f32
    %26 = vector.broadcast %cst_24 : f32 to vector<16x1xf32>
    %27 = arith.addf %25, %26 : vector<16x1xf32>
    %28 = math.rsqrt %27 : vector<16x1xf32>
    %29 = arith.mulf %15, %28 : vector<16x1xf32>
    %30 = arith.mulf %22, %29 : vector<16x1xf32>
    %31 = arith.subf %16, %30 : vector<16x1xf32>
    %32 = vector.broadcast %29 : vector<16x1xf32> to vector<16x16xf32>
    %33 = arith.mulf %6, %32 : vector<16x16xf32>
    %34 = vector.broadcast %31 : vector<16x1xf32> to vector<16x16xf32>
    %35 = arith.addf %33, %34 : vector<16x16xf32>
    %36 = arith.addf %35, %13 : vector<16x16xf32>
    %cst_25 = arith.constant 0.000000e+00 : f32
    %37 = vector.broadcast %cst_25 : f32 to vector<16x16xf32>
    %38 = arith.maximumf %36, %37 : vector<16x16xf32>
    %c0_26 = arith.constant 0 : index
    %c0_27 = arith.constant 0 : index
    %c0_28 = arith.constant 0 : index
    %39 = vector.load %arg10[%c0_26, %c0_27, %c0_28] : memref<1x16x16xf32, #tpu.memory_space<vmem>>, vector<1x16x16xf32>
    %40 = vector.shape_cast %39 : vector<1x16x16xf32> to vector<16x16xf32>
    %41 = vector.shape_cast %38 : vector<16x16xf32> to vector<1x16x16xf32>
    tpu.vector_store %arg10[%c0_26, %c0_27, %c0_28], %41 {strides = array<i32>} : memref<1x16x16xf32, #tpu.memory_space<vmem>>, vector<1x16x16xf32>,
    return
  }
  func.func @transform_0(%arg0: i32) -> (i32, i32, i32) {
    %c0_i32 = arith.constant 0 : i32
    %c0_i32_0 = arith.constant 0 : i32
    %c0_i32_1 = arith.constant 0 : i32
    return %arg0, %c0_i32, %c0_i32_0 : i32, i32, i32
  }
  func.func @transform_1(%arg0: i32) -> (i32, i32) {
    %c0_i32 = arith.constant 0 : i32
    %c0_i32_0 = arith.constant 0 : i32
    %c0_i32_1 = arith.constant 0 : i32
    return %c0_i32, %c0_i32_0 : i32, i32
  }
  func.func @transform_2(%arg0: i32) -> (i32, i32) {
    %c0_i32 = arith.constant 0 : i32
    %c0_i32_0 = arith.constant 0 : i32
    %c0_i32_1 = arith.constant 0 : i32
    return %c0_i32, %c0_i32_0 : i32, i32
  }
  func.func @transform_3(%arg0: i32) -> (i32, i32) {
    %c0_i32 = arith.constant 0 : i32
    %c0_i32_0 = arith.constant 0 : i32
    %c0_i32_1 = arith.constant 0 : i32
    return %c0_i32, %c0_i32_0 : i32, i32
  }
  func.func @transform_4(%arg0: i32) -> (i32, i32) {
    %c0_i32 = arith.constant 0 : i32
    %c0_i32_0 = arith.constant 0 : i32
    %c0_i32_1 = arith.constant 0 : i32
    return %c0_i32, %c0_i32_0 : i32, i32
  }
  func.func @transform_5(%arg0: i32) -> (i32, i32) {
    %c0_i32 = arith.constant 0 : i32
    %c0_i32_0 = arith.constant 0 : i32
    %c0_i32_1 = arith.constant 0 : i32
    return %c0_i32, %c0_i32_0 : i32, i32
  }
  func.func @transform_6(%arg0: i32) -> (i32, i32, i32) {
    %c0_i32 = arith.constant 0 : i32
    %c0_i32_0 = arith.constant 0 : i32
    %c0_i32_1 = arith.constant 0 : i32
    return %arg0, %c0_i32, %c0_i32_0 : i32, i32, i32
  }
  func.func @transform_7(%arg0: i32) -> (i32, i32) {
    %c0_i32 = arith.constant 0 : i32
    %c0_i32_0 = arith.constant 0 : i32
    %c0_i32_1 = arith.constant 0 : i32
    return %c0_i32, %c0_i32_0 : i32, i32
  }
  func.func @transform_8(%arg0: i32) -> (i32, i32) {
    %c0_i32 = arith.constant 0 : i32
    %c0_i32_0 = arith.constant 0 : i32
    %c0_i32_1 = arith.constant 0 : i32
    return %c0_i32, %c0_i32_0 : i32, i32
  }
  func.func @transform_9(%arg0: i32) -> (i32, i32, i32) {
    %c0_i32 = arith.constant 0 : i32
    %c0_i32_0 = arith.constant 0 : i32
    %c0_i32_1 = arith.constant 0 : i32
    return %arg0, %c0_i32, %c0_i32_0 : i32, i32, i32
  }
}

</mosaic_0001>

<bundles_post_ra>
// kernel: _lambda_.3
= control target key start
LH: loop header
LB: loop body
LE: loop exit
PB: predicated region body
PF: predicated region fallthrough
CT: control target
= control target key end

     0   :  { %s1802_s21 = smov 0   ;;  %s1924_s0 = inlined_call_operand.vmem [shape: bf16[2,200,64], index: 0, kind: input, shape index: {}]   ;;  %s1925_s1 = inlined_call_operand.vmem [shape: bf16[16,200], index: 1, kind: input, shape index: {}]   ;;  %s1926_s2 = inlined_call_operand.vmem [shape: f32[16,1], index: 2, kind: input, shape index: {}]   ;;  %s1927_s3 = inlined_call_operand.vmem [shape: f32[16,1], index: 3, kind: input, shape index: {}]   ;;  %s1928_s4 = inlined_call_operand.vmem [shape: f32[16,1], index: 4, kind: input, shape index: {}]   ;;  %s1929_s5 = inlined_call_operand.vmem [shape: f32[16,16], index: 5, kind: input, shape index: {}]   ;;  %s1930_s6 = inlined_call_operand.vmem [shape: bf16[2,16,64], index: 6, kind: output, shape index: {}]  }
   0x1 LB: > { %s1563_s22 = sadd.s32 4294967295, %s1764_s21   ;;  %p1567_p0 = scmp.ge.s32.totalorder %s1764_s21, 1  ;;  %s1764_s21 = sphi %s1802_s21, %s16_s21  }
   0x2   : > { %p212_p1 = scmp.lt.s32.totalorder %s1764_s21, 3 }
   0x4   : > { %p213_p2 = pnand %p1567_p0, %p212_p1 }
   0x5   : > { %p242_p3 = scmp.lt.s32.totalorder (!%p213_p2), %s1563_s22, 1 }
   0x6   : > { %216 = sbr.rel (%p213_p2) target bundleno = 819 (0x333), region = 44 }
   0xb   : > { %vm376_vm0 = vcmask 588800   ;;  %v1766_v0 = vmov 0   ;;  %v1753_v1 = vld [vmem:[%s1925_s1 + $0x4] ss:$8 sps:$4 sm:$0xff]   ;;  %s1932_s22 = smov (!%p242_p3, %s1563_s22), 1  ;;  %vm380_vm1 = vcmask 1043456  }
   0xc   : > { %384 = vmatprep.subr.bf16.mxu0 %v1766_v0  ;;  %1736 = vset.pattern.permute.xlu0 %v1766_v0  ;;  %v281_v2 = vld [vmem:[%s1926_s2 + $0x8] sm:$0xff]  ;;  %v280_v3 = vld [vmem:[%s1926_s2] sm:$0xff]  ;;  %s1726_s29 = smul.u32 100, %s1932_s22  ;;  %vm431_vm2 = vcmask 523264   ;;  %vm446_vm3 = vcmask 130048   ;;  %s1591_s25 = sshll.u32 %s1932_s22, 3 }
   0xd   : > { %289 = vperm.xlu0 %1736, %v281_v2   ;;  %1737 = vset.pattern.permute.xlu1 %v1766_v0  ;;  %v1751_v18 = vld [vmem:[%s1925_s1] ss:$8 sps:$4 sm:$0xff]   ;;  %s251_s28 = scalar_lea.vmem %s1930_s6, %s1591_s25  ;;  %vm1505_vm4 = vcmask 519168  }
   0xe   : > { %1586 = vmatprep.mubr.msk.bf16.mxu0 %vm376_vm0, %v1753_v1  ;;  %s1825_s8 = scalar_lea.vmem %s1924_s0, %s1726_s29  ;;  %v425_v33 = vld [vmem:[%s1929_s5] sm:$0xff]  ;;  %v426_v40 = vld [vmem:[%s1929_s5 + $0x8] sm:$0xff] }
   0xf   : > { %v1738_v4 = vld [vmem:[%s1825_s8 + $0x38] sm:$0xff]   ;;  %v1739_v5 = vld [vmem:[%s1825_s8 + $0x30] sm:$0xff]   ;;  %v1740_v6 = vld [vmem:[%s1825_s8 + $0x28] sm:$0xff]   ;;  %v448_v34 = vsel %vm446_vm3, %v425_v33, 0  ;;  %v451_v41 = vsel %vm446_vm3, %v426_v40, 0 }
  0x10   : > { %385 = vmatpush1.bf16.msra.mxu0 %v1738_v4  ;;  %v1741_v7 = vld [vmem:[%s1825_s8 + $0x20] sm:$0xff]   ;;  %v1742_v8 = vld [vmem:[%s1825_s8 + $0x18] sm:$0xff]   ;;  %v1743_v9 = vld [vmem:[%s1825_s8 + $0x10] sm:$0xff]   ;;  %v1856_v35 = vand.u32 4294901760, %v448_v34  ;;  %v1872_v42 = vand.u32 4294901760, %v451_v41 }
  0x11   : > { %284 = vperm.xlu0 %1736, %v280_v3   ;;  %386 = vmatprep.subr.bf16.mxu0 %v1766_v0  ;;  %v1744_v10 = vld [vmem:[%s1825_s8 + $0x8] sm:$0xff]   ;;  %v1745_v11 = vld [vmem:[%s1825_s8] sm:$0xff]   ;;  %v1747_v14 = vld [vmem:[%s1825_s8 + $0x58] sm:$0xff]  }
  0x12   : > { %v1746_v12 = vld [vmem:[%s1825_s8 + $0x60] ss:$0 sps:$4 sm:$0xff]   ;;  %v1748_v15 = vld [vmem:[%s1825_s8 + $0x50] sm:$0xff]   ;;  %v1749_v16 = vld [vmem:[%s1825_s8 + $0x48] sm:$0xff]   ;;  %v1859_v36 = vsub.f32 %v448_v34, %v1856_v35  ;;  %v1875_v43 = vsub.f32 %v451_v41, %v1872_v42 }
  0x13   : > { %v382_v13 = vsel %vm380_vm1, %v1746_v12, 0  ;;  %v1750_v17 = vld [vmem:[%s1825_s8 + $0x40] sm:$0xff]  }
  0x14   : > { %387 = vmatpush1.bf16.msra.mxu0 %v1739_v5  ;;  %v1862_v37 = vand.u32 4294901760, %v1859_v36  ;;  %v1878_v44 = vand.u32 4294901760, %v1875_v43 }
  0x15   : > { %388 = vmatprep.subr.bf16.mxu0 %v1766_v0 }
  0x16   : > { %v523_v38 = vsub.f32 %v1859_v36, %v1862_v37  ;;  %v533_v47 = vsub.f32 %v1875_v43, %v1878_v44 }
  0x18   : > { %389 = vmatpush1.bf16.msra.mxu0 %v1740_v6  ;;  %v1866_v39 = vand.u32 4294901760, %v523_v38  ;;  %v534_v52 = vand.u32 4294901760, %v533_v47 }
  0x19   : > { %390 = vmatprep.subr.bf16.mxu0 %v1766_v0 }
  0x1a   : > { %1646 = vmatprep.mubr.f32.mxu1 %v1866_v39 }
  0x1c   : > { %391 = vmatpush1.bf16.msra.mxu0 %v1741_v7 }
  0x1d   : > { %392 = vmatprep.subr.bf16.mxu0 %v1766_v0 }
  0x20   : > { %393 = vmatpush1.bf16.msra.mxu0 %v1742_v8 }
  0x21   : > { %394 = vmatprep.subr.bf16.mxu0 %v1766_v0 }
  0x24   : > { %395 = vmatpush1.bf16.msra.mxu0 %v1743_v9 }
  0x25   : > { %396 = vmatprep.subr.bf16.mxu0 %v1766_v0 }
  0x28   : > { %397 = vmatpush1.bf16.msra.mxu0 %v1744_v10 }
  0x29   : > { %398 = vmatprep.subr.bf16.mxu0 %v1766_v0 }
  0x2c   : > { %399 = vmatpush1.bf16.msra.mxu0 %v1745_v11 }
  0x2d   : > { %406 = vmatprep.subr.bf16.mxu0 %v1766_v0 }
  0x30   : > { %407 = vmatpush2.bf16.msra.mxu0 %v382_v13 }
  0x31   : > { %408 = vmatprep.subr.bf16.mxu0 %v1766_v0 }
  0x34   : > { %409 = vmatpush2.bf16.msra.mxu0 %v1747_v14 }
  0x35   : > { %410 = vmatprep.subr.bf16.mxu0 %v1766_v0 }
  0x38   : > { %411 = vmatpush2.bf16.msra.mxu0 %v1748_v15 }
  0x39   : > { %412 = vmatprep.subr.bf16.mxu0 %v1766_v0 }
  0x3c   : > { %413 = vmatpush2.bf16.msra.mxu0 %v1749_v16 }
  0x3d   : > { %414 = vmatprep.subr.bf16.mxu0 %v1766_v0 }
  0x40   : > { %415 = vmatpush2.bf16.msra.mxu0 %v1750_v17 }
  0x43   : > { %417 = vmatmul.mubr.bf16.vlgmr.msra.gmra.mxu0 %v1751_v18 }
  0x88   : > { %v290_v19 = vpop.permute.xlu0 %289 }
  0x8c   : > { %v285_v22 = vpop.permute.xlu0 %284 }
 0x103   : > { %v418_v20 = vpop.f32.mrf.mxu0 }
 0x104   : > { %v1845_v26 = vadd.f32 %v418_v20, %v285_v22 }
 0x105   : > { %v420_v21 = vpop.f32.mrf.mxu0 }
 0x106   : > { %v432_v30 = vsel %vm431_vm2, %v1845_v26, 0.0  ;;  %v438_v31 = vmul.f32 %v1845_v26, %v1845_v26 }
 0x107   : > { %v421_v23 = vpop.f32.mrf.mxu0 }
 0x108   : > { %v1843_v24 = vadd.f32 %v421_v23, %v290_v19  ;;  %v440_v32 = vsel %vm431_vm2, %v438_v31, 0.0 }
 0x109   : > { %v423_v25 = vpop.f32.mrf.mxu0 }
 0x10a   : > { %v435_v27 = vsel %vm431_vm2, %v1843_v24, 0.0  ;;  %v439_v28 = vmul.f32 %v1843_v24, %v1843_v24 }
 0x10b   : > { %436 = vadd.xlane.f32.xlu1 %v435_v27 }
 0x10c   : > { %v443_v29 = vsel %vm431_vm2, %v439_v28, 0.0 }
 0x10d   : > { %444 = vadd.xlane.f32.xlu0 %v443_v29 }
 0x10f   : > { %433 = vadd.xlane.f32.xlu1 %v432_v30 }
 0x113   : > { %441 = vadd.xlane.f32.xlu1 %v440_v32 }
 0x194   : > { %v437_v45 = vpop.xlane.xlu1 %436 }
 0x195   : > { %v482_v46 = vand.u32 4294901760, %v437_v45 }
 0x196   : > { %v445_v59 = vpop.xlane.xlu0 %444 }
 0x197   : > { %v570_v48 = vsub.f32 %v437_v45, %v482_v46  ;;  %1642 = vmatprep.subr.mxu1 %v482_v46  ;;  %v984_v61 = vand.u32 4294901760, %v445_v59 }
 0x198   : > { %1643 = vmatpush3.msra.mxu1 %v482_v46  ;;  %v434_v49 = vpop.xlane.xlu1 %433 }
 0x199   : > { %v485_v50 = vand.u32 4294901760, %v434_v49  ;;  %v571_v51 = vand.u32 4294901760, %v570_v48  ;;  %v1072_v63 = vsub.f32 %v445_v59, %v984_v61  ;;  %v428_v59 = vld [vmem:[%s1927_s3 + $0x8] sm:$0xff] }
 0x19b   : > { %v577_v53 = vsub.f32 %v434_v49, %v485_v50  ;;  %1644 = vmatprep.subr.mxu1 %v485_v50  ;;  %v572_v54 = vsub.f32 %v570_v48, %v571_v51  ;;  %v1073_v1 = vand.u32 4294901760, %v1072_v63 }
 0x19c   : > { %1645 = vmatpush3.msra.mxu1 %v485_v50  ;;  %v442_v60 = vpop.xlane.xlu1 %441 }
 0x19d   : > { %v573_v55 = vand.u32 4294901760, %v572_v54  ;;  %1647 = vmatmul.mubr.f32.vlgmr.msra.gmra.mxu1 %v534_v52  ;;  %v578_v56 = vand.u32 4294901760, %v577_v53  ;;  %v987_v62 = vand.u32 4294901760, %v442_v60  ;;  %v1074_v3 = vsub.f32 %v1072_v63, %v1073_v1 }
 0x19e   : > { %1653 = vmatprep.mubr.f32.mxu1 %v1856_v35 }
 0x19f   : > { %1649 = vmatprep.subr.mxu1 %v573_v55  ;;  %v579_v57 = vsub.f32 %v577_v53, %v578_v56  ;;  %v1079_v0 = vsub.f32 %v442_v60, %v987_v62  ;;  %v1075_v5 = vand.u32 4294901760, %v1074_v3 }
 0x1a0   : > { %1650 = vmatpush3.msra.mxu1 %v573_v55 }
 0x1a1   : > { %v580_v58 = vand.u32 4294901760, %v579_v57  ;;  %v1080_v2 = vand.u32 4294901760, %v1079_v0 }
 0x1a3   : > { %1651 = vmatprep.subr.mxu1 %v580_v58  ;;  %v1081_v4 = vsub.f32 %v1079_v0, %v1080_v2 }
 0x1a4   : > { %1652 = vmatpush3.msra.mxu1 %v580_v58 }
 0x1a5   : > { %1654 = vmatmul.mubr.f32.vlgmr.msra.gmra.mxu1 %v1872_v42  ;;  %1656 = vmatprep.subr.mxu1 %v570_v48  ;;  %v1082_v6 = vand.u32 4294901760, %v1081_v4 }
 0x1a6   : > { %1657 = vmatpush3.msra.mxu1 %v570_v48  ;;  %1660 = vmatprep.mubr.f32.mxu1 %v1859_v36 }
 0x1a7   : > { %1658 = vmatprep.subr.mxu1 %v577_v53 }
 0x1a8   : > { %1659 = vmatpush3.msra.mxu1 %v577_v53 }
 0x1a9   : > { %1661 = vmatmul.mubr.f32.vlgmr.msra.gmra.mxu1 %v1875_v43  ;;  %1663 = vmatprep.subr.mxu1 %v482_v46 }
 0x1aa   : > { %1664 = vmatpush3.msra.mxu1 %v482_v46  ;;  %1667 = vmatprep.mubr.f32.mxu1 %v1862_v37 }
 0x1ab   : > { %1665 = vmatprep.subr.mxu1 %v485_v50 }
 0x1ac   : > { %1666 = vmatpush3.msra.mxu1 %v485_v50 }
 0x1ad   : > { %1668 = vmatmul.mubr.f32.vlgmr.msra.gmra.mxu1 %v1878_v44  ;;  %1670 = vmatprep.subr.mxu1 %v571_v51 }
 0x1ae   : > { %1671 = vmatpush3.msra.mxu1 %v571_v51  ;;  %1674 = vmatprep.mubr.f32.mxu1 %v1856_v35 }
 0x1af   : > { %1672 = vmatprep.subr.mxu1 %v578_v56 }
 0x1b0   : > { %1673 = vmatpush3.msra.mxu1 %v578_v56 }
 0x1b1   : > { %1675 = vmatmul.mubr.f32.vlgmr.msra.gmra.mxu1 %v1872_v42  ;;  %1677 = vmatprep.subr.mxu1 %v482_v46 }
 0x1b2   : > { %1678 = vmatpush3.msra.mxu1 %v482_v46  ;;  %1681 = vmatprep.mubr.f32.mxu1 %v1856_v35 }
 0x1b3   : > { %1679 = vmatprep.subr.mxu1 %v485_v50 }
 0x1b4   : > { %1680 = vmatpush3.msra.mxu1 %v485_v50 }
 0x1b5   : > { %1682 = vmatmul.mubr.f32.vlgmr.msra.gmra.mxu1 %v1872_v42  ;;  %1684 = vmatprep.subr.mxu1 %v984_v61 }
 0x1b6   : > { %1685 = vmatpush3.msra.mxu1 %v984_v61  ;;  %1688 = vmatprep.mubr.f32.mxu1 %v1866_v39 }
 0x1b7   : > { %1686 = vmatprep.subr.mxu1 %v987_v62 }
 0x1b8   : > { %1687 = vmatpush3.msra.mxu1 %v987_v62 }
 0x1b9   : > { %1689 = vmatmul.mubr.f32.vlgmr.msra.gmra.mxu1 %v534_v52  ;;  %1691 = vmatprep.subr.mxu1 %v1075_v5 }
 0x1ba   : > { %1692 = vmatpush3.msra.mxu1 %v1075_v5  ;;  %1695 = vmatprep.mubr.f32.mxu1 %v1856_v35  ;;  %v430_v5 = vld [vmem:[%s1928_s4 + $0x8] sm:$0xff] }
 0x1bb   : > { %1693 = vmatprep.subr.mxu1 %v1082_v6 }
 0x1bc   : > { %1694 = vmatpush3.msra.mxu1 %v1082_v6 }
 0x1bd   : > { %1696 = vmatmul.mubr.f32.vlgmr.msra.gmra.mxu1 %v1872_v42  ;;  %1698 = vmatprep.subr.mxu1 %v1072_v63 }
 0x1be   : > { %1699 = vmatpush3.msra.mxu1 %v1072_v63  ;;  %1702 = vmatprep.mubr.f32.mxu1 %v1859_v36 }
 0x1bf   : > { %1700 = vmatprep.subr.mxu1 %v1079_v0 }
 0x1c0   : > { %1701 = vmatpush3.msra.mxu1 %v1079_v0 }
 0x1c1   : > { %1703 = vmatmul.mubr.f32.vlgmr.msra.gmra.mxu1 %v1875_v43  ;;  %1705 = vmatprep.subr.mxu1 %v984_v61 }
 0x1c2   : > { %1706 = vmatpush3.msra.mxu1 %v984_v61  ;;  %1709 = vmatprep.mubr.f32.mxu1 %v1862_v37 }
 0x1c3   : > { %1707 = vmatprep.subr.mxu1 %v987_v62 }
 0x1c4   : > { %1708 = vmatpush3.msra.mxu1 %v987_v62 }
 0x1c5   : > { %1710 = vmatmul.mubr.f32.vlgmr.msra.gmra.mxu1 %v1878_v44  ;;  %1712 = vmatprep.subr.mxu1 %v1073_v1 }
 0x1c6   : > { %1713 = vmatpush3.msra.mxu1 %v1073_v1  ;;  %1716 = vmatprep.mubr.f32.mxu1 %v1856_v35 }
 0x1c7   : > { %1714 = vmatprep.subr.mxu1 %v1080_v2 }
 0x1c8   : > { %1715 = vmatpush3.msra.mxu1 %v1080_v2  ;;  %v429_v2 = vld [vmem:[%s1928_s4] sm:$0xff] }
 0x1c9   : > { %1717 = vmatmul.mubr.f32.vlgmr.msra.gmra.mxu1 %v1872_v42  ;;  %1719 = vmatprep.subr.mxu1 %v984_v61 }
 0x1ca   : > { %1720 = vmatpush3.msra.mxu1 %v984_v61  ;;  %1723 = vmatprep.mubr.f32.mxu1 %v1856_v35  ;;  %v427_v61 = vld [vmem:[%s1927_s3] sm:$0xff] }
 0x1cb   : > { %1721 = vmatprep.subr.mxu1 %v987_v62 }
 0x1cc   : > { %1722 = vmatpush3.msra.mxu1 %v987_v62 }
 0x1cd   : > { %1724 = vmatmul.mubr.f32.vlgmr.msra.gmra.mxu1 %v1872_v42 }
 0x25d   : > { %v1648_v7 = vpop.f32.mrf.mxu1 }
 0x25f   : > { %v526_v8 = vpop.f32.mrf.mxu1 }
 0x265   : > { %v1655_v9 = vpop.f32.mrf.mxu1 }
 0x266   : > { %v624_v25 = vadd.f32 %v1655_v9, %v1648_v7 }
 0x267   : > { %v617_v10 = vpop.f32.mrf.mxu1 }
 0x268   : > { %v618_v28 = vadd.f32 %v617_v10, %v526_v8 }
 0x269   : > { %v1662_v11 = vpop.f32.mrf.mxu1 }
 0x26a   : > { %v707_v29 = vadd.f32 %v1662_v11, %v624_v25 }
 0x26b   : > { %v699_v12 = vpop.f32.mrf.mxu1 }
 0x26c   : > { %v700_v31 = vadd.f32 %v699_v12, %v618_v28 }
 0x26d   : > { %v1669_v13 = vpop.f32.mrf.mxu1 }
 0x26e   : > { %v790_v32 = vadd.f32 %v1669_v13, %v707_v29 }
 0x26f   : > { %v781_v14 = vpop.f32.mrf.mxu1 }
 0x270   : > { %v782_v35 = vadd.f32 %v781_v14, %v700_v31 }
 0x271   : > { %v1676_v15 = vpop.f32.mrf.mxu1 }
 0x272   : > { %v873_v36 = vadd.f32 %v1676_v15, %v790_v32 }
 0x273   : > { %v866_v16 = vpop.f32.mrf.mxu1 }
 0x274   : > { %v867_v40 = vadd.f32 %v866_v16, %v782_v35 }
 0x275   : > { %v1683_v17 = vpop.f32.mrf.mxu1 }
 0x276   : > { %v952_v41 = vadd.f32 %v1683_v17, %v873_v36 }
 0x277   : > { %v945_v18 = vpop.f32.mrf.mxu1 }
 0x278   : > { %v946_v45 = vadd.f32 %v945_v18, %v867_v40  ;;  %v1458_v49 = vmul.f32 %v952_v41, %v952_v41 }
 0x279   : > { %v1690_v19 = vpop.f32.mrf.mxu1 }
 0x27a   : > { %v1457_v53 = vmul.f32 %v946_v45, %v946_v45 }
 0x27b   : > { %v1028_v20 = vpop.f32.mrf.mxu1 }
 0x27d   : > { %v1697_v21 = vpop.f32.mrf.mxu1 }
 0x27e   : > { %v1126_v33 = vadd.f32 %v1697_v21, %v1690_v19 }
 0x27f   : > { %v1119_v22 = vpop.f32.mrf.mxu1 }
 0x280   : > { %v1120_v37 = vadd.f32 %v1119_v22, %v1028_v20 }
 0x281   : > { %v1704_v23 = vpop.f32.mrf.mxu1 }
 0x282   : > { %v1209_v38 = vadd.f32 %v1704_v23, %v1126_v33 }
 0x283   : > { %v1201_v27 = vpop.f32.mrf.mxu1 }
 0x284   : > { %v1202_v42 = vadd.f32 %v1201_v27, %v1120_v37 }
 0x285   : > { %v1711_v30 = vpop.f32.mrf.mxu1 }
 0x286   : > { %v1292_v43 = vadd.f32 %v1711_v30, %v1209_v38 }
 0x287   : > { %v1283_v34 = vpop.f32.mrf.mxu1 }
 0x288   : > { %v1284_v46 = vadd.f32 %v1283_v34, %v1202_v42 }
 0x289   : > { %v1718_v39 = vpop.f32.mrf.mxu1 }
 0x28a   : > { %v1375_v47 = vadd.f32 %v1718_v39, %v1292_v43 }
 0x28b   : > { %v1368_v44 = vpop.f32.mrf.mxu1 }
 0x28c   : > { %v1369_v50 = vadd.f32 %v1368_v44, %v1284_v46 }
 0x28d   : > { %v1725_v48 = vpop.f32.mrf.mxu1 }
 0x28e   : > { %v1454_v51 = vadd.f32 %v1725_v48, %v1375_v47 }
 0x28f   : > { %v1447_v52 = vpop.f32.mrf.mxu1 }
 0x290   : > { %v1460_v54 = vsub.f32 %v1454_v51, %v1458_v49  ;;  %v1448_v55 = vadd.f32 %v1447_v52, %v1369_v50 }
 0x292   : > { %v1462_v56 = vadd.f32 1e-05, %v1460_v54  ;;  %v1459_v57 = vsub.f32 %v1448_v55, %v1457_v53 }
 0x294   : > { %1754 = vrsqrt.f32 %v1462_v56  ;;  %v1461_v58 = vadd.f32 1e-05, %v1459_v57 }
 0x296   : > { %1756 = vrsqrt.f32 %v1461_v58 }
 0x2a1   : > { %v1755_v60 = vpop.eup %1754 }
 0x2a2   : > { %v1466_v62 = vmul.f32 %v1755_v60, %v428_v59 }
 0x2a3   : > { %v1757_v63 = vpop.eup %1756 }
 0x2a4   : > { %1478 = vperm.xlu1 %1737, %v1466_v62   ;;  %v1465_v0 = vmul.f32 %v1757_v63, %v427_v61  ;;  %v1468_v4 = vmul.f32 %v1466_v62, %v952_v41 }
 0x2a6   : > { %v1467_v1 = vmul.f32 %v1465_v0, %v946_v45  ;;  %v1470_v6 = vsub.f32 %v430_v5, %v1468_v4 }
 0x2a8   : > { %1473 = vperm.xlu1 %1737, %v1465_v0   ;;  %v1469_v3 = vsub.f32 %v429_v2, %v1467_v1 }
 0x2ac   : > { %1485 = vperm.xlu1 %1737, %v1469_v3  }
 0x2b0   : > { %1490 = vperm.xlu1 %1737, %v1470_v6  }
 0x31f   : > { %v1479_v7 = vpop.permute.xlu1 %1478 }
 0x320   : > { %v1482_v12 = vmul.f32 %v1479_v7, %v1843_v24 }
 0x323   : > { %v1474_v8 = vpop.permute.xlu1 %1473 }
 0x324   : > { %v1481_v9 = vmul.f32 %v1474_v8, %v1845_v26 }
 0x327   : > { %v1486_v10 = vpop.permute.xlu1 %1485 }
 0x328   : > { %v1493_v11 = vadd.f32 %v1486_v10, %v1481_v9 }
 0x32a   : > { %v1495_v13 = vmax.f32 %v1493_v11, 0.0 }
 0x32b   : > { %v1491_v14 = vpop.permute.xlu1 %1490 }
 0x32c   : > { %v1592_v15 = vpack.c.bf16 %v1495_v13, %v1495_v13  ;;  %v1494_v16 = vadd.f32 %v1491_v14, %v1482_v12 }
 0x32e   : > { %1506 = vst.msk [vmem:[%s251_s28] sm:$0xf] %vm1505_vm4, %v1592_v15  ;;  %v1496_v17 = vmax.f32 %v1494_v16, 0.0 }
 0x330   : > { %v1593_v18 = vpack.c.bf16 %v1496_v17, %v1496_v17 }
 0x332   : > { %1507 = vst.msk [vmem:[%s251_s28 + $0x4] sm:$0xf] %vm1505_vm4, %v1593_v18 }
 0x333 PF: > { %s16_s21 = sadd.s32 1, %s1764_s21  }
 0x334   : > { %p13_p4 = scmp.ge.s32.totalorder %s16_s21, 4  }
 0x336   :  { %15 = sbr.rel (!%p13_p4) target bundleno = 1 (0x1), region = 74 }

// kernel: _lambda_.4
= control target key start
LH: loop header
LB: loop body
LE: loop exit
PB: predicated region body
PF: predicated region fallthrough
CT: control target
= control target key end

     0   :  { %s2000_s21 = smov 0   ;;  %s2163_s0 = inlined_call_operand.vmem [shape: bf16[2,400,16], index: 0, kind: input, shape index: {}]   ;;  %s2164_s1 = inlined_call_operand.vmem [shape: bf16[16,400], index: 1, kind: input, shape index: {}]   ;;  %s2165_s2 = inlined_call_operand.vmem [shape: f32[16,1], index: 2, kind: input, shape index: {}]   ;;  %s2166_s3 = inlined_call_operand.vmem [shape: f32[16,1], index: 3, kind: input, shape index: {}]   ;;  %s2167_s4 = inlined_call_operand.vmem [shape: f32[16,1], index: 4, kind: input, shape index: {}]   ;;  %s2168_s5 = inlined_call_operand.vmem [shape: f32[16,16], index: 5, kind: input, shape index: {}]   ;;  %s2169_s6 = inlined_call_operand.vmem [shape: bf16[2,16,16], index: 6, kind: output, shape index: {}]  }
   0x1 LB: > { %s1710_s22 = sadd.s32 4294967295, %s1962_s21   ;;  %p1714_p0 = scmp.ge.s32.totalorder %s1962_s21, 1  ;;  %s1962_s21 = sphi %s2000_s21, %s16_s21  }
   0x2   : > { %p212_p1 = scmp.lt.s32.totalorder %s1962_s21, 3 }
   0x4   : > { %p213_p2 = pnand %p1714_p0, %p212_p1 }
   0x5   : > { %p242_p3 = scmp.lt.s32.totalorder (!%p213_p2), %s1710_s22, 1 }
   0x6   : > { %216 = sbr.rel (%p213_p2) target bundleno = 792 (0x318), region = 44 }
   0xb   : > { %v1964_v0 = vmov 0   ;;  %v1947_v1 = vld [vmem:[%s2164_s1 + $0x4] ss:$16 sps:$4 sm:$0xff]   ;;  %vm488_vm0 = vcmask 130048   ;;  %s2171_s22 = smov (!%p242_p3, %s1710_s22), 1  ;;  %v308_v3 = vld [vmem:[%s2165_s2 + $0x8] sm:$0xff] }
   0xc   : > { %533 = vmatprep.subr.bf16.mxu1 %v1964_v0  ;;  %1919 = vset.pattern.permute.xlu0 %v1964_v0  ;;  %v1951_v2 = vld [vmem:[%s2164_s1 + $0xc] ss:$16 sps:$4 sm:$0xff]   ;;  %s1909_s29 = smul.u32 200, %s2171_s22  ;;  %v307_v4 = vld [vmem:[%s2165_s2] sm:$0xff]  ;;  %v1949_v31 = vld [vmem:[%s2164_s1 + $0x8] ss:$16 sps:$4 sm:$0xff]  }
   0xd   : > { %1920 = vset.pattern.permute.xlu1 %v1964_v0  ;;  %524 = vmatprep.mubr.bf16.mxu0 %v1947_v1  ;;  %v1945_v29 = vld [vmem:[%s2164_s1] ss:$16 sps:$4 sm:$0xff]   ;;  %v575_v61 = vld [vmem:[%s2168_s5 + $0x8] sm:$0xff]  ;;  %vm1652_vm1 = vcmask 125952  }
   0xe   : > { %316 = vperm.xlu0 %1919, %v308_v3   ;;  %1747 = vmatprep.mubr.msk.bf16.mxu1 %vm488_vm0, %v1951_v2  ;;  %s2030_s10 = scalar_lea.vmem %s2163_s0, %s1909_s29  ;;  %v574_v54 = vld [vmem:[%s2168_s5] sm:$0xff]  ;;  %v598_v62 = vsel %vm488_vm0, %v575_v61, 0  ;;  %s1752_s29 = sshll.u32 %s2171_s22, 3 }
   0xf   : > { %v1921_v5 = vld [vmem:[%s2030_s10 + $0x78] sm:$0xff]   ;;  %v1924_v8 = vld [vmem:[%s2030_s10 + $0x70] sm:$0xff]   ;;  %v1927_v11 = vld [vmem:[%s2030_s10 + $0x68] sm:$0xff]   ;;  %v595_v55 = vsel %vm488_vm0, %v574_v54, 0  ;;  %v2104_v63 = vand.u32 4294901760, %v598_v62  ;;  %s251_s8 = scalar_lea.vmem %s2169_s6, %s1752_s29 }
  0x10   : > { %v1922_v6 = vld [vmem:[%s2030_s10 + $0xb8] sm:$0xff]   ;;  %1755 = vmatprep.subr.bf16.mxu0 %v1921_v5  ;;  %v1925_v9 = vld [vmem:[%s2030_s10 + $0xb0] sm:$0xff]   ;;  %v1928_v12 = vld [vmem:[%s2030_s10 + $0xa8] sm:$0xff]   ;;  %v2089_v56 = vand.u32 4294901760, %v595_v55 }
  0x11   : > { %v1923_v7 = vld [vmem:[%s2030_s10 + $0x38] sm:$0xff]   ;;  %534 = vmatpush1.bf16.msra.mxu1 %v1922_v6  ;;  %v1926_v10 = vld [vmem:[%s2030_s10 + $0x30] sm:$0xff]   ;;  %v1929_v13 = vld [vmem:[%s2030_s10 + $0x28] sm:$0xff]  }
  0x12   : > { %311 = vperm.xlu0 %1919, %v307_v4   ;;  %1756 = vmatpush3.bf16.msra.mxu0 %v1923_v7  ;;  %v1930_v14 = vld [vmem:[%s2030_s10 + $0x60] sm:$0xff]   ;;  %v1933_v17 = vld [vmem:[%s2030_s10 + $0x58] sm:$0xff]   ;;  %v1936_v20 = vld [vmem:[%s2030_s10 + $0x50] sm:$0xff]   ;;  %v2092_v57 = vsub.f32 %v595_v55, %v2089_v56 }
  0x13   : > { %535 = vmatprep.subr.bf16.mxu1 %v1964_v0  ;;  %1757 = vmatprep.subr.bf16.mxu0 %v1924_v8  ;;  %v1931_v15 = vld [vmem:[%s2030_s10 + $0xa0] sm:$0xff]   ;;  %v1934_v18 = vld [vmem:[%s2030_s10 + $0x98] sm:$0xff]   ;;  %v1937_v21 = vld [vmem:[%s2030_s10 + $0x90] sm:$0xff]  }
  0x14   : > { %v1932_v16 = vld [vmem:[%s2030_s10 + $0x20] sm:$0xff]   ;;  %v1935_v19 = vld [vmem:[%s2030_s10 + $0x18] sm:$0xff]   ;;  %v1938_v22 = vld [vmem:[%s2030_s10 + $0x10] sm:$0xff]   ;;  %v2095_v58 = vand.u32 4294901760, %v2092_v57 }
  0x15   : > { %536 = vmatpush1.bf16.msra.mxu1 %v1925_v9  ;;  %v1939_v23 = vld [vmem:[%s2030_s10 + $0x48] sm:$0xff]   ;;  %v1942_v26 = vld [vmem:[%s2030_s10 + $0x40] sm:$0xff]  }
  0x16   : > { %1758 = vmatpush3.bf16.msra.mxu0 %v1926_v10  ;;  %537 = vmatprep.subr.bf16.mxu1 %v1964_v0  ;;  %v1940_v24 = vld [vmem:[%s2030_s10 + $0x88] sm:$0xff]   ;;  %v1943_v27 = vld [vmem:[%s2030_s10 + $0x80] sm:$0xff]   ;;  %v670_v59 = vsub.f32 %v2092_v57, %v2095_v58 }
  0x17   : > { %1759 = vmatprep.subr.bf16.mxu0 %v1927_v11  ;;  %v1941_v25 = vld [vmem:[%s2030_s10 + $0x8] sm:$0xff]   ;;  %v1944_v28 = vld [vmem:[%s2030_s10] sm:$0xff]  }
  0x18   : > { %v1948_v30 = vld [vmem:[%s2030_s10 + $0xc0] sm:$0xff]   ;;  %v671_v60 = vand.u32 4294901760, %v670_v59 }
  0x19   : > { %538 = vmatpush1.bf16.msra.mxu1 %v1928_v12 }
  0x1a   : > { %1760 = vmatpush3.bf16.msra.mxu0 %v1929_v13  ;;  %539 = vmatprep.subr.bf16.mxu1 %v1964_v0 }
  0x1b   : > { %1761 = vmatprep.subr.bf16.mxu0 %v1930_v14 }
  0x1d   : > { %540 = vmatpush1.bf16.msra.mxu1 %v1931_v15 }
  0x1e   : > { %1762 = vmatpush3.bf16.msra.mxu0 %v1932_v16  ;;  %541 = vmatprep.subr.bf16.mxu1 %v1964_v0 }
  0x1f   : > { %1763 = vmatprep.subr.bf16.mxu0 %v1933_v17 }
  0x21   : > { %542 = vmatpush1.bf16.msra.mxu1 %v1934_v18 }
  0x22   : > { %1764 = vmatpush3.bf16.msra.mxu0 %v1935_v19  ;;  %543 = vmatprep.subr.bf16.mxu1 %v1964_v0 }
  0x23   : > { %1765 = vmatprep.subr.bf16.mxu0 %v1936_v20 }
  0x25   : > { %544 = vmatpush1.bf16.msra.mxu1 %v1937_v21 }
  0x26   : > { %1766 = vmatpush3.bf16.msra.mxu0 %v1938_v22  ;;  %545 = vmatprep.subr.bf16.mxu1 %v1964_v0 }
  0x27   : > { %1767 = vmatprep.subr.bf16.mxu0 %v1939_v23 }
  0x29   : > { %546 = vmatpush1.bf16.msra.mxu1 %v1940_v24 }
  0x2a   : > { %1768 = vmatpush3.bf16.msra.mxu0 %v1941_v25  ;;  %547 = vmatprep.subr.bf16.mxu1 %v1964_v0 }
  0x2b   : > { %1769 = vmatprep.subr.bf16.mxu0 %v1942_v26 }
  0x2d   : > { %548 = vmatpush1.bf16.msra.mxu1 %v1943_v27 }
  0x2e   : > { %1770 = vmatpush3.bf16.msra.mxu0 %v1944_v28  ;;  %563 = vmatprep.subr.bf16.mxu1 %v1964_v0  ;;  %v2107_v0 = vsub.f32 %v598_v62, %v2104_v63 }
  0x30   : > { %v2110_v1 = vand.u32 4294901760, %v2107_v0 }
  0x31   : > { %525 = vmatmul.mubr.bf16.vlgmr.msra.gmra.mxu0 %v1945_v29  ;;  %564 = vmatpush2.bf16.msra.mxu1 %v1948_v30 }
  0x32   : > { %1829 = vmatprep.mubr.f32.mxu0 %v671_v60  ;;  %v680_v4 = vsub.f32 %v2107_v0, %v2110_v1 }
  0x34   : > { %566 = vmatmul.mubr.bf16.vlgmr.msra.gmra.mxu1 %v1949_v31  ;;  %v681_v9 = vand.u32 4294901760, %v680_v4 }
  0x35   : > { %1843 = vmatprep.mubr.f32.mxu1 %v2092_v57 }
  0x89   : > { %v317_v32 = vpop.permute.xlu0 %316 }
  0x8d   : > { %v312_v39 = vpop.permute.xlu0 %311 }
  0xf1   : > { %v1771_v33 = vpop.f32.mrf.mxu0 }
  0xf3   : > { %v1772_v34 = vpop.f32.mrf.mxu0 }
  0xf4   : > { %v567_v35 = vpop.f32.mrf.mxu1  ;;  %v1773_v37 = vadd.f32 %v1772_v34, %v1771_v33 }
  0xf5   : > { %v1774_v36 = vpop.f32.mrf.mxu0 }
  0xf6   : > { %v569_v38 = vpop.f32.mrf.mxu1  ;;  %v527_v43 = vadd.f32 %v1773_v37, %v312_v39 }
  0xf7   : > { %v1775_v40 = vpop.f32.mrf.mxu0 }
  0xf8   : > { %v1776_v41 = vadd.f32 %v1775_v40, %v1774_v36  ;;  %v570_v42 = vpop.f32.mrf.mxu1  ;;  %v2073_v47 = vadd.f32 %v567_v35, %v527_v43 }
  0xfa   : > { %v530_v44 = vadd.f32 %v1776_v41, %v317_v32  ;;  %v572_v45 = vpop.f32.mrf.mxu1  ;;  %v580_v51 = vsel %vm488_vm0, %v2073_v47, 0.0  ;;  %v586_v52 = vmul.f32 %v2073_v47, %v2073_v47 }
  0xfc   : > { %v2071_v46 = vadd.f32 %v570_v42, %v530_v44  ;;  %v588_v53 = vsel %vm488_vm0, %v586_v52, 0.0 }
  0xfe   : > { %v583_v48 = vsel %vm488_vm0, %v2071_v46, 0.0  ;;  %v587_v49 = vmul.f32 %v2071_v46, %v2071_v46 }
  0xff   : > { %584 = vadd.xlane.f32.xlu1 %v583_v48 }
 0x100   : > { %v591_v50 = vsel %vm488_vm0, %v587_v49, 0.0 }
 0x101   : > { %592 = vadd.xlane.f32.xlu0 %v591_v50 }
 0x103   : > { %581 = vadd.xlane.f32.xlu1 %v580_v51 }
 0x107   : > { %589 = vadd.xlane.f32.xlu1 %v588_v53 }
 0x188   : > { %v585_v2 = vpop.xlane.xlu1 %584 }
 0x189   : > { %v629_v3 = vand.u32 4294901760, %v585_v2 }
 0x18a   : > { %v593_v12 = vpop.xlane.xlu0 %592 }
 0x18b   : > { %v717_v5 = vsub.f32 %v585_v2, %v629_v3  ;;  %1825 = vmatprep.subr.mxu0 %v629_v3  ;;  %v2115_v17 = vand.u32 4294901760, %v593_v12 }
 0x18c   : > { %1826 = vmatpush3.msra.mxu0 %v629_v3  ;;  %v582_v6 = vpop.xlane.xlu1 %581 }
 0x18d   : > { %v632_v7 = vand.u32 4294901760, %v582_v6  ;;  %1839 = vmatprep.subr.mxu1 %v717_v5  ;;  %v718_v8 = vand.u32 4294901760, %v717_v5  ;;  %v1219_v20 = vsub.f32 %v593_v12, %v2115_v17 }
 0x18e   : > { %1840 = vmatpush3.msra.mxu1 %v717_v5 }
 0x18f   : > { %v724_v10 = vsub.f32 %v582_v6, %v632_v7  ;;  %1827 = vmatprep.subr.mxu0 %v632_v7  ;;  %v719_v11 = vsub.f32 %v717_v5, %v718_v8  ;;  %v1220_v22 = vand.u32 4294901760, %v1219_v20 }
 0x190   : > { %1828 = vmatpush3.msra.mxu0 %v632_v7  ;;  %v590_v15 = vpop.xlane.xlu1 %589 }
 0x191   : > { %1841 = vmatprep.subr.mxu1 %v724_v10  ;;  %v720_v13 = vand.u32 4294901760, %v719_v11  ;;  %1830 = vmatmul.mubr.f32.vlgmr.msra.gmra.mxu0 %v681_v9  ;;  %v725_v14 = vand.u32 4294901760, %v724_v10  ;;  %v1134_v19 = vand.u32 4294901760, %v590_v15  ;;  %v1221_v24 = vsub.f32 %v1219_v20, %v1220_v22 }
 0x192   : > { %1842 = vmatpush3.msra.mxu1 %v724_v10  ;;  %1836 = vmatprep.mubr.f32.mxu0 %v2089_v56 }
 0x193   : > { %1832 = vmatprep.subr.mxu0 %v720_v13  ;;  %1853 = vmatprep.subr.mxu1 %v718_v8  ;;  %v726_v16 = vsub.f32 %v724_v10, %v725_v14  ;;  %v1226_v21 = vsub.f32 %v590_v15, %v1134_v19  ;;  %v1222_v26 = vand.u32 4294901760, %v1221_v24 }
 0x194   : > { %1833 = vmatpush3.msra.mxu0 %v720_v13  ;;  %1844 = vmatmul.mubr.f32.vlgmr.msra.gmra.mxu1 %v2107_v0 }
 0x195   : > { %1854 = vmatpush3.msra.mxu1 %v718_v8  ;;  %v727_v18 = vand.u32 4294901760, %v726_v16  ;;  %1857 = vmatprep.mubr.f32.mxu1 %v2089_v56  ;;  %v1227_v23 = vand.u32 4294901760, %v1226_v21  ;;  %v577_v16 = vld [vmem:[%s2166_s3 + $0x8] sm:$0xff] }
 0x196   : > { %1855 = vmatprep.subr.mxu1 %v725_v14 }
 0x197   : > { %1856 = vmatpush3.msra.mxu1 %v725_v14  ;;  %1834 = vmatprep.subr.mxu0 %v727_v18  ;;  %v1228_v25 = vsub.f32 %v1226_v21, %v1227_v23 }
 0x198   : > { %1867 = vmatprep.subr.mxu1 %v2115_v17  ;;  %1835 = vmatpush3.msra.mxu0 %v727_v18  ;;  %v576_v18 = vld [vmem:[%s2166_s3] sm:$0xff] }
 0x199   : > { %1858 = vmatmul.mubr.f32.vlgmr.msra.gmra.mxu1 %v2104_v63  ;;  %1837 = vmatmul.mubr.f32.vlgmr.msra.gmra.mxu0 %v2104_v63  ;;  %v1229_v27 = vand.u32 4294901760, %v1228_v25 }
 0x19a   : > { %1868 = vmatpush3.msra.mxu1 %v2115_v17  ;;  %1846 = vmatprep.subr.mxu0 %v629_v3 }
 0x19b   : > { %1869 = vmatprep.subr.mxu1 %v1134_v19  ;;  %1847 = vmatpush3.msra.mxu0 %v629_v3 }
 0x19c   : > { %1870 = vmatpush3.msra.mxu1 %v1134_v19  ;;  %1848 = vmatprep.subr.mxu0 %v632_v7 }
 0x19d   : > { %1871 = vmatprep.mubr.f32.mxu1 %v671_v60  ;;  %1881 = vmatprep.subr.mxu1 %v1219_v20 }
 0x19e   : > { %1849 = vmatpush3.msra.mxu0 %v632_v7  ;;  %1850 = vmatprep.mubr.f32.mxu0 %v2095_v58 }
 0x19f   : > { %1872 = vmatmul.mubr.f32.vlgmr.msra.gmra.mxu1 %v681_v9  ;;  %1851 = vmatmul.mubr.f32.vlgmr.msra.gmra.mxu0 %v2110_v1 }
 0x1a0   : > { %1882 = vmatpush3.msra.mxu1 %v1219_v20  ;;  %1860 = vmatprep.subr.mxu0 %v629_v3 }
 0x1a1   : > { %1883 = vmatprep.subr.mxu1 %v1226_v21  ;;  %1861 = vmatpush3.msra.mxu0 %v629_v3 }
 0x1a2   : > { %1884 = vmatpush3.msra.mxu1 %v1226_v21  ;;  %1862 = vmatprep.subr.mxu0 %v632_v7 }
 0x1a3   : > { %1885 = vmatprep.mubr.f32.mxu1 %v2092_v57  ;;  %1895 = vmatprep.subr.mxu1 %v1220_v22 }
 0x1a4   : > { %1863 = vmatpush3.msra.mxu0 %v632_v7  ;;  %1864 = vmatprep.mubr.f32.mxu0 %v2089_v56 }
 0x1a5   : > { %1886 = vmatmul.mubr.f32.vlgmr.msra.gmra.mxu1 %v2107_v0  ;;  %1865 = vmatmul.mubr.f32.vlgmr.msra.gmra.mxu0 %v2104_v63 }
 0x1a6   : > { %1896 = vmatpush3.msra.mxu1 %v1220_v22  ;;  %1874 = vmatprep.subr.mxu0 %v1222_v26 }
 0x1a7   : > { %1897 = vmatprep.subr.mxu1 %v1227_v23  ;;  %1875 = vmatpush3.msra.mxu0 %v1222_v26  ;;  %v579_v26 = vld [vmem:[%s2167_s4 + $0x8] sm:$0xff] }
 0x1a8   : > { %1898 = vmatpush3.msra.mxu1 %v1227_v23  ;;  %1876 = vmatprep.subr.mxu0 %v1229_v27  ;;  %v578_v23 = vld [vmem:[%s2167_s4] sm:$0xff] }
 0x1a9   : > { %1877 = vmatpush3.msra.mxu0 %v1229_v27  ;;  %1878 = vmatprep.mubr.f32.mxu0 %v2089_v56 }
 0x1aa   : > { %1879 = vmatmul.mubr.f32.vlgmr.msra.gmra.mxu0 %v2104_v63  ;;  %1888 = vmatprep.subr.mxu0 %v2115_v17 }
 0x1ab   : > { %1889 = vmatpush3.msra.mxu0 %v2115_v17  ;;  %1892 = vmatprep.mubr.f32.mxu0 %v2095_v58 }
 0x1ac   : > { %1890 = vmatprep.subr.mxu0 %v1134_v19  ;;  %1899 = vmatprep.mubr.f32.mxu1 %v2089_v56 }
 0x1ad   : > { %1891 = vmatpush3.msra.mxu0 %v1134_v19  ;;  %1900 = vmatmul.mubr.f32.vlgmr.msra.gmra.mxu1 %v2104_v63 }
 0x1ae   : > { %1893 = vmatmul.mubr.f32.vlgmr.msra.gmra.mxu0 %v2110_v1  ;;  %1902 = vmatprep.subr.mxu0 %v2115_v17 }
 0x1af   : > { %1903 = vmatpush3.msra.mxu0 %v2115_v17  ;;  %1906 = vmatprep.mubr.f32.mxu0 %v2089_v56 }
 0x1b0   : > { %1904 = vmatprep.subr.mxu0 %v1134_v19 }
 0x1b1   : > { %1905 = vmatpush3.msra.mxu0 %v1134_v19 }
 0x1b2   : > { %1907 = vmatmul.mubr.f32.vlgmr.msra.gmra.mxu0 %v2104_v63 }
 0x251   : > { %v1831_v28 = vpop.f32.mrf.mxu0 }
 0x253   : > { %v673_v31 = vpop.f32.mrf.mxu0 }
 0x254   : > { %v1845_v29 = vpop.f32.mrf.mxu1 }
 0x256   : > { %v846_v30 = vpop.f32.mrf.mxu1 }
 0x259   : > { %v1838_v32 = vpop.f32.mrf.mxu0  ;;  %v1859_v33 = vpop.f32.mrf.mxu1 }
 0x25a   : > { %v771_v36 = vadd.f32 %v1838_v32, %v1831_v28 }
 0x25b   : > { %v764_v34 = vpop.f32.mrf.mxu0  ;;  %v1013_v35 = vpop.f32.mrf.mxu1 }
 0x25c   : > { %v765_v39 = vadd.f32 %v764_v34, %v673_v31  ;;  %v854_v42 = vadd.f32 %v1845_v29, %v771_v36 }
 0x25e   : > { %v847_v43 = vadd.f32 %v846_v30, %v765_v39 }
 0x25f   : > { %v1852_v37 = vpop.f32.mrf.mxu0  ;;  %v1873_v38 = vpop.f32.mrf.mxu1 }
 0x260   : > { %v937_v48 = vadd.f32 %v1852_v37, %v854_v42 }
 0x261   : > { %v928_v40 = vpop.f32.mrf.mxu0  ;;  %v1175_v41 = vpop.f32.mrf.mxu1 }
 0x262   : > { %v929_v50 = vadd.f32 %v928_v40, %v847_v43  ;;  %v1020_v53 = vadd.f32 %v1859_v33, %v937_v48 }
 0x264   : > { %v1014_v56 = vadd.f32 %v1013_v35, %v929_v50 }
 0x265   : > { %v1866_v44 = vpop.f32.mrf.mxu0  ;;  %v1887_v45 = vpop.f32.mrf.mxu1 }
 0x266   : > { %v1099_v61 = vadd.f32 %v1866_v44, %v1020_v53 }
 0x267   : > { %v1092_v49 = vpop.f32.mrf.mxu0  ;;  %v1348_v52 = vpop.f32.mrf.mxu1 }
 0x268   : > { %v1093_v1 = vadd.f32 %v1092_v49, %v1014_v56  ;;  %v1605_v6 = vmul.f32 %v1099_v61, %v1099_v61 }
 0x26a   : > { %v1880_v51 = vpop.f32.mrf.mxu0  ;;  %v1604_v10 = vmul.f32 %v1093_v1, %v1093_v1 }
 0x26b   : > { %v1273_v54 = vadd.f32 %v1880_v51, %v1873_v38 }
 0x26c   : > { %v1266_v55 = vpop.f32.mrf.mxu0 }
 0x26d   : > { %v1356_v57 = vadd.f32 %v1887_v45, %v1273_v54  ;;  %v1267_v58 = vadd.f32 %v1266_v55, %v1175_v41  ;;  %v1901_v60 = vpop.f32.mrf.mxu1 }
 0x26e   : > { %v1894_v59 = vpop.f32.mrf.mxu0 }
 0x26f   : > { %v1349_v62 = vadd.f32 %v1348_v52, %v1267_v58  ;;  %v1439_v63 = vadd.f32 %v1894_v59, %v1356_v57  ;;  %v1515_v4 = vpop.f32.mrf.mxu1 }
 0x270   : > { %v1430_v0 = vpop.f32.mrf.mxu0 }
 0x271   : > { %v1522_v2 = vadd.f32 %v1901_v60, %v1439_v63  ;;  %v1431_v3 = vadd.f32 %v1430_v0, %v1349_v62 }
 0x272   : > { %v1908_v5 = vpop.f32.mrf.mxu0 }
 0x273   : > { %v1516_v7 = vadd.f32 %v1515_v4, %v1431_v3  ;;  %v1601_v8 = vadd.f32 %v1908_v5, %v1522_v2 }
 0x274   : > { %v1594_v9 = vpop.f32.mrf.mxu0 }
 0x275   : > { %v1607_v11 = vsub.f32 %v1601_v8, %v1605_v6  ;;  %v1595_v12 = vadd.f32 %v1594_v9, %v1516_v7 }
 0x277   : > { %v1609_v13 = vadd.f32 1e-05, %v1607_v11  ;;  %v1606_v14 = vsub.f32 %v1595_v12, %v1604_v10 }
 0x279   : > { %1952 = vrsqrt.f32 %v1609_v13  ;;  %v1608_v15 = vadd.f32 1e-05, %v1606_v14 }
 0x27b   : > { %1954 = vrsqrt.f32 %v1608_v15 }
 0x286   : > { %v1953_v17 = vpop.eup %1952 }
 0x287   : > { %v1613_v19 = vmul.f32 %v1953_v17, %v577_v16 }
 0x288   : > { %v1955_v20 = vpop.eup %1954 }
 0x289   : > { %1625 = vperm.xlu1 %1920, %v1613_v19   ;;  %v1612_v21 = vmul.f32 %v1955_v20, %v576_v18  ;;  %v1615_v25 = vmul.f32 %v1613_v19, %v1099_v61 }
 0x28b   : > { %v1614_v22 = vmul.f32 %v1612_v21, %v1093_v1  ;;  %v1617_v27 = vsub.f32 %v579_v26, %v1615_v25 }
 0x28d   : > { %1620 = vperm.xlu1 %1920, %v1612_v21   ;;  %v1616_v24 = vsub.f32 %v578_v23, %v1614_v22 }
 0x291   : > { %1632 = vperm.xlu1 %1920, %v1616_v24  }
 0x295   : > { %1637 = vperm.xlu1 %1920, %v1617_v27  }
 0x304   : > { %v1626_v28 = vpop.permute.xlu1 %1625 }
 0x305   : > { %v1629_v33 = vmul.f32 %v1626_v28, %v2071_v46 }
 0x308   : > { %v1621_v29 = vpop.permute.xlu1 %1620 }
 0x309   : > { %v1628_v30 = vmul.f32 %v1621_v29, %v2073_v47 }
 0x30c   : > { %v1633_v31 = vpop.permute.xlu1 %1632 }
 0x30d   : > { %v1640_v32 = vadd.f32 %v1633_v31, %v1628_v30 }
 0x30f   : > { %v1642_v34 = vmax.f32 %v1640_v32, 0.0 }
 0x310   : > { %v1638_v35 = vpop.permute.xlu1 %1637 }
 0x311   : > { %v1753_v36 = vpack.c.bf16 %v1642_v34, %v1642_v34  ;;  %v1641_v37 = vadd.f32 %v1638_v35, %v1629_v33 }
 0x313   : > { %1653 = vst.msk [vmem:[%s251_s8] sm:$0xf] %vm1652_vm1, %v1753_v36  ;;  %v1643_v38 = vmax.f32 %v1641_v37, 0.0 }
 0x315   : > { %v1754_v39 = vpack.c.bf16 %v1643_v38, %v1643_v38 }
 0x317   : > { %1654 = vst.msk [vmem:[%s251_s8 + $0x4] sm:$0xf] %vm1652_vm1, %v1754_v39 }
 0x318 PF: > { %s16_s21 = sadd.s32 1, %s1962_s21  }
 0x319   : > { %p13_p4 = scmp.ge.s32.totalorder %s16_s21, 4  }
 0x31b   :  { %15 = sbr.rel (!%p13_p4) target bundleno = 1 (0x1), region = 74 }

// kernel: _lambda_.5
= control target key start
LH: loop header
LB: loop body
LE: loop exit
PB: predicated region body
PF: predicated region fallthrough
CT: control target
= control target key end

     0   :  { %s1959_s30 = smov 0   ;;  %s2116_s0 = inlined_call_operand.vmem [shape: bf16[2,144,16], index: 0, kind: input, shape index: {}]   ;;  %s2117_s1 = inlined_call_operand.vmem [shape: bf16[16,144], index: 1, kind: input, shape index: {}]   ;;  %s2118_s2 = inlined_call_operand.vmem [shape: f32[16,1], index: 2, kind: input, shape index: {}]   ;;  %s2119_s3 = inlined_call_operand.vmem [shape: f32[16,1], index: 3, kind: input, shape index: {}]   ;;  %s2120_s4 = inlined_call_operand.vmem [shape: f32[16,1], index: 4, kind: input, shape index: {}]   ;;  %s2121_s5 = inlined_call_operand.vmem [shape: f32[16,16], index: 5, kind: input, shape index: {}]   ;;  %s2122_s6 = inlined_call_operand.vmem [shape: bf16[2,8,16], index: 6, kind: input, shape index: {}]   ;;  %s2123_s7 = inlined_call_operand.vmem [shape: bf16[16,8], index: 7, kind: input, shape index: {}]   ;;  %s2124_s8 = inlined_call_operand.vmem [shape: f32[16,1], index: 8, kind: input, shape index: {}]   ;;  %s2125_s9 = inlined_call_operand.vmem [shape: f32[2,16,16], index: 9, kind: output, shape index: {}]  }
   0x1 LB: > { %s1701_s10 = sadd.s32 4294967295, %s1904_s30   ;;  %p1705_p0 = scmp.ge.s32.totalorder %s1904_s30, 1  ;;  %s1904_s30 = sphi %s1959_s30, %s19_s30  }
   0x2   : > { %p296_p1 = scmp.lt.s32.totalorder %s1904_s30, 3 }
   0x4   : > { %p297_p2 = pnand %p1705_p0, %p296_p1 }
   0x5   : > { %p336_p3 = scmp.lt.s32.totalorder (!%p297_p2), %s1701_s10, 1 }
   0x6   : > { %300 = sbr.rel (%p297_p2) target bundleno = 792 (0x318), region = 56 }
   0xb   : > { %v1906_v0 = vmov 0   ;;  %v1892_v1 = vld [vmem:[%s2117_s1 + $0x4] ss:$8 sps:$4 sm:$0xff]   ;;  %vm446_vm0 = vcmask 130048   ;;  %s2127_s10 = smov (!%p336_p3, %s1701_s10), 1  ;;  %vm515_vm1 = vcmask 1043456  }
   0xc   : > { %450 = vmatprep.subr.bf16.mxu0 %v1906_v0  ;;  %1879 = vset.pattern.permute.xlu0 %v1906_v0  ;;  %v372_v2 = vld [vmem:[%s2118_s2 + $0x8] sm:$0xff]  ;;  %v371_v3 = vld [vmem:[%s2118_s2] sm:$0xff]  ;;  %s1867_s17 = smul.u32 72, %s2127_s10  ;;  %s1707_s23 = sshll.u32 %s2127_s10, 2  ;;  %v1907_v14 = vmov 0.0   ;;  %vm1908_vm2 = vmmov 0  }
   0xd   : > { %380 = vperm.xlu0 %1879, %v372_v2   ;;  %1880 = vset.pattern.permute.xlu1 %v1906_v0  ;;  %v1890_v13 = vld [vmem:[%s2117_s1] ss:$8 sps:$4 sm:$0xff]   ;;  %s344_s26 = scalar_lea.vmem %s2122_s6, %s1707_s23  ;;  %vm511_vm3 = vcmask 64512  }
   0xe   : > { %1721 = vmatprep.mubr.msk.bf16.mxu0 %vm446_vm0, %v1892_v1  ;;  %s340_s20 = scalar_lea.vmem %s2116_s0, %s1867_s17  ;;  %1777 = vmatprep.subr.bf16.mxu1 %v1907_v14  ;;  %v493_v15 = vld [vmem:[%s344_s26] sm:$0xf]  ;;  %v495_v40 = vld [vmem:[%s2124_s8 + $0x8] sm:$0xff]  ;;  %s1726_s26 = sshll.u32 %s2127_s10, 4 }
   0xf   : > { %v1881_v4 = vld [vmem:[%s340_s20 + $0x38] sm:$0xff]   ;;  %v1882_v5 = vld [vmem:[%s340_s20 + $0x30] sm:$0xff]   ;;  %v1883_v6 = vld [vmem:[%s340_s20 + $0x28] sm:$0xff]   ;;  %1779 = vmatprep.mubr.msk.bf16.mxu1 %vm1908_vm2, %v1907_v14  ;;  %v517_v16 = vsel %vm515_vm1, %v493_v15, 0  ;;  %s349_s29 = scalar_lea.vmem %s2125_s9, %s1726_s26 }
  0x10   : > { %451 = vmatpush1.bf16.msra.mxu0 %v1881_v4  ;;  %v1884_v7 = vld [vmem:[%s340_s20 + $0x20] sm:$0xff]   ;;  %v1885_v8 = vld [vmem:[%s340_s20 + $0x18] sm:$0xff]   ;;  %v1886_v9 = vld [vmem:[%s340_s20 + $0x10] sm:$0xff]   ;;  %1778 = vmatpush3.bf16.msra.mxu1 %v517_v16 }
  0x11   : > { %375 = vperm.xlu0 %1879, %v371_v3   ;;  %452 = vmatprep.subr.bf16.mxu0 %v1906_v0  ;;  %v1887_v10 = vld [vmem:[%s340_s20 + $0x8] sm:$0xff]   ;;  %v1888_v11 = vld [vmem:[%s340_s20] sm:$0xff]  }
  0x12   : > { %v1889_v12 = vld [vmem:[%s340_s20 + $0x40] sm:$0xff]   ;;  %v561_v45 = vld [vmem:[%s2121_s5 + $0x8] sm:$0xff] }
  0x13   : > { %v1893_v17 = vld [vmem:[%s2123_s7] sm:$0xff]   ;;  %v584_v46 = vsel %vm446_vm0, %v561_v45, 0 }
  0x14   : > { %453 = vmatpush1.bf16.msra.mxu0 %v1882_v5  ;;  %1780 = vmatmul.mubr.msk.bf16.vlgmr.msra.gmra.mxu1 %vm511_vm3, %v1893_v17  ;;  %v560_v32 = vld [vmem:[%s2121_s5] sm:$0xff]  ;;  %v2039_v47 = vand.u32 4294901760, %v584_v46 }
  0x15   : > { %454 = vmatprep.subr.bf16.mxu0 %v1906_v0  ;;  %v581_v33 = vsel %vm446_vm0, %v560_v32, 0  ;;  %v494_v39 = vld [vmem:[%s2124_s8] sm:$0xff] }
  0x16   : > { %v2011_v34 = vand.u32 4294901760, %v581_v33  ;;  %v664_v48 = vsub.f32 %v584_v46, %v2039_v47 }
  0x18   : > { %455 = vmatpush1.bf16.msra.mxu0 %v1883_v6  ;;  %v2014_v35 = vsub.f32 %v581_v33, %v2011_v34  ;;  %v2042_v49 = vand.u32 4294901760, %v664_v48 }
  0x19   : > { %456 = vmatprep.subr.bf16.mxu0 %v1906_v0 }
  0x1a   : > { %v2017_v36 = vand.u32 4294901760, %v2014_v35  ;;  %v666_v52 = vsub.f32 %v664_v48, %v2042_v49 }
  0x1c   : > { %457 = vmatpush1.bf16.msra.mxu0 %v1884_v7  ;;  %v656_v37 = vsub.f32 %v2014_v35, %v2017_v36  ;;  %v2050_v60 = vand.u32 4294901760, %v666_v52 }
  0x1d   : > { %458 = vmatprep.subr.bf16.mxu0 %v1906_v0 }
  0x1e   : > { %v2022_v38 = vand.u32 4294901760, %v656_v37 }
  0x20   : > { %459 = vmatpush1.bf16.msra.mxu0 %v1885_v8  ;;  %1787 = vmatprep.mubr.f32.mxu1 %v2022_v38 }
  0x21   : > { %460 = vmatprep.subr.bf16.mxu0 %v1906_v0 }
  0x24   : > { %461 = vmatpush1.bf16.msra.mxu0 %v1886_v9 }
  0x25   : > { %462 = vmatprep.subr.bf16.mxu0 %v1906_v0 }
  0x28   : > { %463 = vmatpush1.bf16.msra.mxu0 %v1887_v10 }
  0x29   : > { %464 = vmatprep.subr.bf16.mxu0 %v1906_v0 }
  0x2c   : > { %465 = vmatpush1.bf16.msra.mxu0 %v1888_v11 }
  0x2d   : > { %480 = vmatprep.subr.bf16.mxu0 %v1906_v0 }
  0x30   : > { %481 = vmatpush2.bf16.msra.mxu0 %v1889_v12 }
  0x33   : > { %483 = vmatmul.mubr.bf16.vlgmr.msra.gmra.mxu0 %v1890_v13 }
  0x34   : > { %1843 = vmatprep.mubr.f32.mxu0 %v2014_v35 }
  0x88   : > { %v381_v18 = vpop.permute.xlu0 %380 }
  0x8c   : > { %v376_v21 = vpop.permute.xlu0 %375 }
  0xd4   : > { %v2031_v41 = vpop.f32.mrf.mxu1 }
  0xd6   : > { %v1781_v42 = vpop.f32.mrf.mxu1 }
  0xd8   : > { %v2033_v43 = vpop.f32.mrf.mxu1 }
  0xda   : > { %v1782_v44 = vpop.f32.mrf.mxu1 }
  0xf3   : > { %v484_v19 = vpop.f32.mrf.mxu0 }
  0xf4   : > { %v1995_v25 = vadd.f32 %v484_v19, %v376_v21 }
  0xf5   : > { %v486_v20 = vpop.f32.mrf.mxu0 }
  0xf6   : > { %v566_v29 = vsel %vm446_vm0, %v1995_v25, 0.0  ;;  %v572_v30 = vmul.f32 %v1995_v25, %v1995_v25 }
  0xf7   : > { %v487_v22 = vpop.f32.mrf.mxu0 }
  0xf8   : > { %v1993_v23 = vadd.f32 %v487_v22, %v381_v18  ;;  %v574_v31 = vsel %vm446_vm0, %v572_v30, 0.0 }
  0xf9   : > { %v489_v24 = vpop.f32.mrf.mxu0 }
  0xfa   : > { %v569_v26 = vsel %vm446_vm0, %v1993_v23, 0.0  ;;  %v573_v27 = vmul.f32 %v1993_v23, %v1993_v23 }
  0xfb   : > { %570 = vadd.xlane.f32.xlu1 %v569_v26 }
  0xfc   : > { %v577_v28 = vsel %vm446_vm0, %v573_v27, 0.0 }
  0xfd   : > { %578 = vadd.xlane.f32.xlu0 %v577_v28 }
  0xff   : > { %567 = vadd.xlane.f32.xlu1 %v566_v29 }
 0x103   : > { %575 = vadd.xlane.f32.xlu1 %v574_v31 }
 0x114   : > { %498 = vperm.xlu1 %1880, %v494_v39  }
 0x118   : > { %503 = vperm.xlu1 %1880, %v495_v40  }
 0x184   : > { %v571_v50 = vpop.xlane.xlu1 %570 }
 0x185   : > { %v615_v51 = vand.u32 4294901760, %v571_v50 }
 0x186   : > { %v579_v53 = vpop.xlane.xlu0 %578 }
 0x187   : > { %v703_v54 = vsub.f32 %v571_v50, %v615_v51  ;;  %v2045_v55 = vand.u32 4294901760, %v579_v53  ;;  %1783 = vmatprep.subr.mxu1 %v615_v51 }
 0x188   : > { %1784 = vmatpush3.msra.mxu1 %v615_v51  ;;  %v568_v56 = vpop.xlane.xlu1 %567 }
 0x189   : > { %v2048_v57 = vsub.f32 %v579_v53, %v2045_v55  ;;  %v618_v58 = vand.u32 4294901760, %v568_v56  ;;  %v704_v59 = vand.u32 4294901760, %v703_v54 }
 0x18b   : > { %v710_v61 = vsub.f32 %v568_v56, %v618_v58  ;;  %1785 = vmatprep.subr.mxu1 %v618_v58  ;;  %1839 = vmatprep.subr.mxu0 %v2048_v57  ;;  %v705_v62 = vsub.f32 %v703_v54, %v704_v59  ;;  %v1206_v6 = vand.u32 4294901760, %v2048_v57 }
 0x18c   : > { %1786 = vmatpush3.msra.mxu1 %v618_v58  ;;  %1840 = vmatpush3.msra.mxu0 %v2048_v57  ;;  %v576_v63 = vpop.xlane.xlu1 %575 }
 0x18d   : > { %v2054_v0 = vand.u32 4294901760, %v576_v63  ;;  %v706_v1 = vand.u32 4294901760, %v705_v62  ;;  %1788 = vmatmul.mubr.f32.vlgmr.msra.gmra.mxu1 %v2050_v60  ;;  %v711_v2 = vand.u32 4294901760, %v710_v61  ;;  %v1207_v8 = vsub.f32 %v2048_v57, %v1206_v6 }
 0x18e   : > { %1794 = vmatprep.mubr.f32.mxu1 %v2011_v34 }
 0x18f   : > { %v1212_v3 = vsub.f32 %v576_v63, %v2054_v0  ;;  %1790 = vmatprep.subr.mxu1 %v706_v1  ;;  %v712_v4 = vsub.f32 %v710_v61, %v711_v2  ;;  %v1208_v10 = vand.u32 4294901760, %v1207_v8  ;;  %v564_v8 = vld [vmem:[%s2120_s4] sm:$0xff] }
 0x190   : > { %1791 = vmatpush3.msra.mxu1 %v706_v1 }
 0x191   : > { %1841 = vmatprep.subr.mxu0 %v1212_v3  ;;  %v713_v5 = vand.u32 4294901760, %v712_v4  ;;  %v1213_v7 = vand.u32 4294901760, %v1212_v3  ;;  %v562_v4 = vld [vmem:[%s2119_s3] sm:$0xff] }
 0x192   : > { %1842 = vmatpush3.msra.mxu0 %v1212_v3 }
 0x193   : > { %1792 = vmatprep.subr.mxu1 %v713_v5  ;;  %1853 = vmatprep.subr.mxu0 %v1206_v6  ;;  %v1214_v9 = vsub.f32 %v1212_v3, %v1213_v7 }
 0x194   : > { %1793 = vmatpush3.msra.mxu1 %v713_v5  ;;  %1844 = vmatmul.mubr.f32.vlgmr.msra.gmra.mxu0 %v664_v48 }
 0x195   : > { %1854 = vmatpush3.msra.mxu0 %v1206_v6  ;;  %1795 = vmatmul.mubr.f32.vlgmr.msra.gmra.mxu1 %v2039_v47  ;;  %v1215_v11 = vand.u32 4294901760, %v1214_v9 }
 0x196   : > { %1797 = vmatprep.subr.mxu1 %v703_v54  ;;  %1855 = vmatprep.subr.mxu0 %v1213_v7 }
 0x197   : > { %1798 = vmatpush3.msra.mxu1 %v703_v54  ;;  %1856 = vmatpush3.msra.mxu0 %v1213_v7 }
 0x198   : > { %1799 = vmatprep.subr.mxu1 %v710_v61  ;;  %1801 = vmatprep.mubr.f32.mxu1 %v2014_v35 }
 0x199   : > { %1800 = vmatpush3.msra.mxu1 %v710_v61  ;;  %1857 = vmatprep.mubr.f32.mxu0 %v2011_v34 }
 0x19a   : > { %1802 = vmatmul.mubr.f32.vlgmr.msra.gmra.mxu1 %v664_v48  ;;  %1804 = vmatprep.subr.mxu1 %v615_v51 }
 0x19b   : > { %1805 = vmatpush3.msra.mxu1 %v615_v51  ;;  %1808 = vmatprep.mubr.f32.mxu1 %v2017_v36 }
 0x19c   : > { %1806 = vmatprep.subr.mxu1 %v618_v58  ;;  %1858 = vmatmul.mubr.f32.vlgmr.msra.gmra.mxu0 %v2039_v47 }
 0x19d   : > { %1807 = vmatpush3.msra.mxu1 %v618_v58 }
 0x19e   : > { %1809 = vmatmul.mubr.f32.vlgmr.msra.gmra.mxu1 %v2042_v49  ;;  %1811 = vmatprep.subr.mxu1 %v704_v59 }
 0x19f   : > { %1812 = vmatpush3.msra.mxu1 %v704_v59  ;;  %1815 = vmatprep.mubr.f32.mxu1 %v2011_v34 }
 0x1a0   : > { %1813 = vmatprep.subr.mxu1 %v711_v2 }
 0x1a1   : > { %1814 = vmatpush3.msra.mxu1 %v711_v2  ;;  %v563_v2 = vld [vmem:[%s2119_s3 + $0x8] sm:$0xff] }
 0x1a2   : > { %1816 = vmatmul.mubr.f32.vlgmr.msra.gmra.mxu1 %v2039_v47  ;;  %1818 = vmatprep.subr.mxu1 %v615_v51 }
 0x1a3   : > { %1819 = vmatpush3.msra.mxu1 %v615_v51  ;;  %1822 = vmatprep.mubr.f32.mxu1 %v2011_v34 }
 0x1a4   : > { %1820 = vmatprep.subr.mxu1 %v618_v58 }
 0x1a5   : > { %1821 = vmatpush3.msra.mxu1 %v618_v58 }
 0x1a6   : > { %1823 = vmatmul.mubr.f32.vlgmr.msra.gmra.mxu1 %v2039_v47  ;;  %1825 = vmatprep.subr.mxu1 %v2045_v55 }
 0x1a7   : > { %1826 = vmatpush3.msra.mxu1 %v2045_v55  ;;  %1829 = vmatprep.mubr.f32.mxu1 %v2022_v38 }
 0x1a8   : > { %1827 = vmatprep.subr.mxu1 %v2054_v0 }
 0x1a9   : > { %1828 = vmatpush3.msra.mxu1 %v2054_v0 }
 0x1aa   : > { %1830 = vmatmul.mubr.f32.vlgmr.msra.gmra.mxu1 %v2050_v60  ;;  %1832 = vmatprep.subr.mxu1 %v1208_v10 }
 0x1ab   : > { %1833 = vmatpush3.msra.mxu1 %v1208_v10  ;;  %1836 = vmatprep.mubr.f32.mxu1 %v2011_v34 }
 0x1ac   : > { %1834 = vmatprep.subr.mxu1 %v1215_v11 }
 0x1ad   : > { %1835 = vmatpush3.msra.mxu1 %v1215_v11  ;;  %v565_v11 = vld [vmem:[%s2120_s4 + $0x8] sm:$0xff] }
 0x1ae   : > { %1837 = vmatmul.mubr.f32.vlgmr.msra.gmra.mxu1 %v2039_v47  ;;  %1846 = vmatprep.subr.mxu1 %v2045_v55 }
 0x1af   : > { %1847 = vmatpush3.msra.mxu1 %v2045_v55  ;;  %1850 = vmatprep.mubr.f32.mxu1 %v2017_v36 }
 0x1b0   : > { %1848 = vmatprep.subr.mxu1 %v2054_v0 }
 0x1b1   : > { %1849 = vmatpush3.msra.mxu1 %v2054_v0 }
 0x1b2   : > { %1851 = vmatmul.mubr.f32.vlgmr.msra.gmra.mxu1 %v2042_v49  ;;  %1860 = vmatprep.subr.mxu1 %v2045_v55 }
 0x1b3   : > { %1861 = vmatpush3.msra.mxu1 %v2045_v55  ;;  %1864 = vmatprep.mubr.f32.mxu1 %v2011_v34 }
 0x1b4   : > { %1862 = vmatprep.subr.mxu1 %v2054_v0 }
 0x1b5   : > { %1863 = vmatpush3.msra.mxu1 %v2054_v0 }
 0x1b6   : > { %1865 = vmatmul.mubr.f32.vlgmr.msra.gmra.mxu1 %v2039_v47 }
 0x24d   : > { %v1789_v12 = vpop.f32.mrf.mxu1 }
 0x24f   : > { %v659_v13 = vpop.f32.mrf.mxu1 }
 0x254   : > { %v1845_v27 = vpop.f32.mrf.mxu0 }
 0x255   : > { %v1796_v14 = vpop.f32.mrf.mxu1 }
 0x256   : > { %v757_v28 = vadd.f32 %v1796_v14, %v1789_v12  ;;  %v1334_v33 = vpop.f32.mrf.mxu0  ;;  %v499_v14 = vpop.permute.xlu1 %498 }
 0x257   : > { %v750_v15 = vpop.f32.mrf.mxu1 }
 0x258   : > { %v751_v30 = vadd.f32 %v750_v15, %v659_v13 }
 0x25a   : > { %v1803_v16 = vpop.f32.mrf.mxu1  ;;  %v504_v15 = vpop.permute.xlu1 %503 }
 0x25b   : > { %v840_v31 = vadd.f32 %v1803_v16, %v757_v28 }
 0x25c   : > { %v832_v17 = vpop.f32.mrf.mxu1  ;;  %v1859_v45 = vpop.f32.mrf.mxu0 }
 0x25d   : > { %v833_v34 = vadd.f32 %v832_v17, %v751_v30 }
 0x25e   : > { %v1810_v18 = vpop.f32.mrf.mxu1  ;;  %v1501_v54 = vpop.f32.mrf.mxu0 }
 0x25f   : > { %v923_v35 = vadd.f32 %v1810_v18, %v840_v31 }
 0x260   : > { %v914_v19 = vpop.f32.mrf.mxu1 }
 0x261   : > { %v915_v38 = vadd.f32 %v914_v19, %v833_v34 }
 0x262   : > { %v1817_v20 = vpop.f32.mrf.mxu1 }
 0x263   : > { %v1006_v39 = vadd.f32 %v1817_v20, %v923_v35  ;;  %v554_v20 = vadd.f32 %v2031_v41, %v499_v14 }
 0x264   : > { %v999_v21 = vpop.f32.mrf.mxu1 }
 0x265   : > { %v1000_v46 = vadd.f32 %v999_v21, %v915_v38 }
 0x266   : > { %v1824_v22 = vpop.f32.mrf.mxu1 }
 0x267   : > { %v1085_v47 = vadd.f32 %v1824_v22, %v1006_v39 }
 0x268   : > { %v1078_v24 = vpop.f32.mrf.mxu1 }
 0x269   : > { %v1079_v51 = vadd.f32 %v1078_v24, %v1000_v46  ;;  %v1591_v56 = vmul.f32 %v1085_v47, %v1085_v47 }
 0x26a   : > { %v1831_v26 = vpop.f32.mrf.mxu1 }
 0x26b   : > { %v1590_v60 = vmul.f32 %v1079_v51, %v1079_v51 }
 0x26c   : > { %v1161_v29 = vpop.f32.mrf.mxu1 }
 0x26e   : > { %v1838_v32 = vpop.f32.mrf.mxu1 }
 0x26f   : > { %v1259_v36 = vadd.f32 %v1838_v32, %v1831_v26  ;;  %v557_v26 = vadd.f32 %v2033_v43, %v504_v15 }
 0x270   : > { %v1252_v37 = vpop.f32.mrf.mxu1 }
 0x271   : > { %v1342_v40 = vadd.f32 %v1845_v27, %v1259_v36  ;;  %v1253_v42 = vadd.f32 %v1252_v37, %v1161_v29 }
 0x272   : > { %v1852_v44 = vpop.f32.mrf.mxu1 }
 0x273   : > { %v1335_v48 = vadd.f32 %v1334_v33, %v1253_v42  ;;  %v1425_v49 = vadd.f32 %v1852_v44, %v1342_v40 }
 0x274   : > { %v1416_v50 = vpop.f32.mrf.mxu1 }
 0x275   : > { %v1508_v52 = vadd.f32 %v1859_v45, %v1425_v49  ;;  %v1417_v53 = vadd.f32 %v1416_v50, %v1335_v48 }
 0x276   : > { %v1866_v55 = vpop.f32.mrf.mxu1 }
 0x277   : > { %v1502_v57 = vadd.f32 %v1501_v54, %v1417_v53  ;;  %v1587_v58 = vadd.f32 %v1866_v55, %v1508_v52 }
 0x278   : > { %v1580_v59 = vpop.f32.mrf.mxu1 }
 0x279   : > { %v1593_v61 = vsub.f32 %v1587_v58, %v1591_v56  ;;  %v1581_v62 = vadd.f32 %v1580_v59, %v1502_v57 }
 0x27b   : > { %v1595_v63 = vadd.f32 1e-05, %v1593_v61  ;;  %v1592_v0 = vsub.f32 %v1581_v62, %v1590_v60 }
 0x27d   : > { %1894 = vrsqrt.f32 %v1595_v63  ;;  %v1594_v1 = vadd.f32 1e-05, %v1592_v0 }
 0x27f   : > { %1896 = vrsqrt.f32 %v1594_v1 }
 0x28a   : > { %v1895_v3 = vpop.eup %1894 }
 0x28b   : > { %v1599_v5 = vmul.f32 %v1895_v3, %v563_v2 }
 0x28c   : > { %v1897_v6 = vpop.eup %1896 }
 0x28d   : > { %1611 = vperm.xlu1 %1880, %v1599_v5   ;;  %v1598_v7 = vmul.f32 %v1897_v6, %v562_v4  ;;  %v1601_v10 = vmul.f32 %v1599_v5, %v1085_v47 }
 0x28f   : > { %v1600_v9 = vmul.f32 %v1598_v7, %v1079_v51  ;;  %v1603_v13 = vsub.f32 %v565_v11, %v1601_v10 }
 0x291   : > { %1606 = vperm.xlu1 %1880, %v1598_v7   ;;  %v1602_v12 = vsub.f32 %v564_v8, %v1600_v9 }
 0x293   : > { %1618 = vperm.xlu0 %1879, %v1602_v12  }
 0x295   : > { %1623 = vperm.xlu1 %1880, %v1603_v13  }
 0x308   : > { %v1612_v16 = vpop.permute.xlu1 %1611 }
 0x309   : > { %v1615_v21 = vmul.f32 %v1612_v16, %v1993_v23 }
 0x30c   : > { %v1607_v17 = vpop.permute.xlu1 %1606 }
 0x30d   : > { %v1614_v18 = vmul.f32 %v1607_v17, %v1995_v25 }
 0x30e   : > { %v1619_v19 = vpop.permute.xlu0 %1618 }
 0x30f   : > { %v1626_v22 = vadd.f32 %v1619_v19, %v1614_v18 }
 0x310   : > { %v1624_v24 = vpop.permute.xlu1 %1623 }
 0x311   : > { %v1628_v27 = vadd.f32 %v1626_v22, %v554_v20  ;;  %v1627_v28 = vadd.f32 %v1624_v24, %v1615_v21 }
 0x313   : > { %v1630_v29 = vmax.f32 %v1628_v27, 0.0  ;;  %v1629_v30 = vadd.f32 %v1627_v28, %v557_v26 }
 0x315   : > { %1632 = vst.msk [vmem:[%s349_s29] sm:$0xff] %vm446_vm0, %v1630_v29  ;;  %v1631_v25 = vmax.f32 %v1629_v30, 0.0 }
 0x317   : > { %1633 = vst.msk [vmem:[%s349_s29 + $0x8] sm:$0xff] %vm446_vm0, %v1631_v25 }
 0x318 PF: > { %s19_s30 = sadd.s32 1, %s1904_s30  }
 0x319   : > { %p16_p4 = scmp.ge.s32.totalorder %s19_s30, 4  }
 0x31b   :  { %18 = sbr.rel (!%p16_p4) target bundleno = 1 (0x1), region = 89 }

</bundles_post_ra>
